<compile_context>
chip_gen: v7x
topology: tpu7x:2x2x1
jax: 0.10.0
libtpu: 0.0.40
codegen_flags: <defaults>
</compile_context>

<pallas_src>
import functools
from typing import NamedTuple

import jax
import jax.numpy as jnp
from jax import lax
from jax.experimental import pallas as pl
from jax.experimental.pallas import tpu as pltpu

LANE = 128
_NEG_BIG = -1e30  # finite "minus infinity" for masked softmax lanes


# --------------------------------------------------------------------------- #
# Kernel
# --------------------------------------------------------------------------- #
def _ensemble_kernel(x_ref, w_ref, b_ref, agg_ref, o_ref, *,
                     member_offsets, num_classes, inv_num):
    """Fused ensemble forward for one batch tile.

    x_ref:   (tb, D)     f32   activations (cast to bf16 in VMEM -> no extra HBM pass)
    w_ref:   (D, Gf)     bf16  lane-packed member weights
    b_ref:   (1, Gf)     f32   lane-packed member biases (pad lanes irrelevant, masked)
    agg_ref: (Gf, OutW)  f32   0/1 scatter: packed member lane -> class lane
    o_ref:   (tb, OutW)  f32   averaged probabilities (lane-dense; wrapper slices)
    """
    # One fused MXU matmul over all packed members, bf16 in / f32 accumulate.
    x = x_ref[...].astype(jnp.bfloat16)
    logits = jnp.dot(x, w_ref[...], preferred_element_type=jnp.float32) + b_ref[...]

    lane = lax.broadcasted_iota(jnp.int32, logits.shape, 1)
    probs = jnp.zeros_like(logits)

    # Per-member masked softmax on the packed lanes.
    # TODO(synk): for large ensembles, replace this static unroll with a
    # lax.fori_loop + per-lane max/denominator scatter to bound vreg live ranges.
    for off in member_offsets:  # static Python ints -> pure VPU compares
        mask = (lane >= off) & (lane < off + num_classes)
        lm = jnp.where(mask, logits, _NEG_BIG)          # exclude other members / pad lanes
        mx = jnp.max(lm, axis=-1, keepdims=True)
        e = jnp.exp(lm - mx)                            # non-member lanes underflow to 0
        denom = jnp.sum(e, axis=-1, keepdims=True)
        # EUP reciprocal; fold the 1/num_models ensemble average into the column mul.
        probs = probs + e * (pl.reciprocal(denom, approx=True) * inv_num)

    # Sum member segments into class lanes 0..num_classes with a tiny 0/1 matmul
    # (MXU; keeps the store lane-dense and handles multi-group packing).
    o_ref[...] = jnp.dot(probs, agg_ref[...], preferred_element_type=jnp.float32)


# --------------------------------------------------------------------------- #
# One-time parameter packing (hoisted out of the per-call forward path)
# --------------------------------------------------------------------------- #
class EnsembleParams(NamedTuple):
    w_fused: jax.Array          # [D, fused_w] bf16, lane-packed member weights
    b_fused: jax.Array          # [1, fused_w] f32,  lane-packed member biases
    agg: jax.Array              # [fused_w, out_w] f32, 0/1 member-lane -> class-lane
    member_offsets: tuple       # static lane offset of each member
    num_models: int
    num_classes: int


def prepare_ensemble_params(weights, biases):
    """Pack per-member Linear heads into fused kernel operands (run once per ensemble).

    weights: [M, D, C] f32  (transpose of torch Linear's [out, in] layout)
    biases:  [M, 1, C] f32
    """
    num_models, d, num_classes = weights.shape
    assert biases.shape == (num_models, 1, num_classes)

    out_w = LANE * pl.cdiv(num_classes, LANE)           # lane-dense output width (>=128)
    group_w = out_w                                      # lane width allotted per group
    members_per_group = max(1, group_w // num_classes)   # e.g. 12 members for 10 classes
    num_groups = pl.cdiv(num_models, members_per_group)
    fused_w = num_groups * group_w

    member_offsets = tuple(
        (m // members_per_group) * group_w + (m % members_per_group) * num_classes
        for m in range(num_models))

    w_fused = jnp.zeros((d, fused_w), jnp.float32)
    b_fused = jnp.zeros((1, fused_w), jnp.float32)       # pad-lane values masked in-kernel
    agg = jnp.zeros((fused_w, out_w), jnp.float32)
    class_eye = jnp.eye(num_classes, out_w, dtype=jnp.float32)
    for m, off in enumerate(member_offsets):
        w_fused = w_fused.at[:, off:off + num_classes].set(weights[m])
        b_fused = b_fused.at[:, off:off + num_classes].set(biases[m])
        agg = agg.at[off:off + num_classes, :].set(class_eye)

    return EnsembleParams(
        w_fused=w_fused.astype(jnp.bfloat16),
        b_fused=b_fused,
        agg=agg,
        member_offsets=member_offsets,
        num_models=num_models,
        num_classes=num_classes,
    )


# --------------------------------------------------------------------------- #
# pallas_call builder + forward wrapper
# --------------------------------------------------------------------------- #
def _round_up(n, m):
    return ((n + m - 1) // m) * m


def _pick_batch_tile(batch):
    """Sublane-aligned batch tile; >=2 grid steps when possible (v7x megacore);
    256-row tiles for large batches (sweep 128-512 per generation if hot)."""
    if batch <= 8:
        return 8
    if batch <= 512:
        return _round_up(pl.cdiv(batch, 2), 8)
    return 256


def _make_pallas_call(*, tb, n_steps, d, fused_w, out_w, member_offsets,
                      num_classes, inv_num, single_buffer_consts):
    kernel = functools.partial(
        _ensemble_kernel,
        member_offsets=member_offsets,
        num_classes=num_classes,
        inv_num=inv_num)

    # Weights / bias / scatter matrix have constant index maps: one VMEM buffer
    # is enough (matters most on v7x's 64 MiB VMEM/TC).
    const_kw = {"pipeline_mode": pl.Buffered(1)} if single_buffer_consts else {}

    in_specs = [
        pl.BlockSpec((tb, d), lambda i: (i, 0)),                        # x batch tile
        pl.BlockSpec((d, fused_w), lambda i: (0, 0), **const_kw),       # packed weights
        pl.BlockSpec((1, fused_w), lambda i: (0, 0), **const_kw),       # packed biases
        pl.BlockSpec((fused_w, out_w), lambda i: (0, 0), **const_kw),   # member->class scatter
    ]
    return pl.pallas_call(
        kernel,
        out_shape=jax.ShapeDtypeStruct((n_steps * tb, out_w), jnp.float32),
        grid_spec=pltpu.PrefetchScalarGridSpec(
            num_scalar_prefetch=0,
            grid=(n_steps,),
            in_specs=in_specs,
            out_specs=pl.BlockSpec((tb, out_w), lambda i: (i, 0)),      # lane-dense slab
        ),
        compiler_params=pltpu.CompilerParams(
            dimension_semantics=("parallel",),
            vmem_limit_bytes=48 * 1024 * 1024,   # under v7x's 64 MiB/TC; ample on v5e/v6e
        ),
    )


def ensemble_net_forward(x_nchw, params: EnsembleParams):
    """out[b, c] = (1/M) * sum_m softmax(x_flat @ W_m + b_m, axis=1)[b, c]."""
    b_sz = x_nchw.shape[0]
    d = params.w_fused.shape[0]
    fused_w = params.w_fused.shape[1]
    out_w = params.agg.shape[1]

    # torch x.view(B, -1); stays f32 — the bf16 MXU cast happens inside the kernel.
    x_flat = x_nchw.reshape(b_sz, d)

    # Fixed-size batch tiles + zero-padded tail: bounded VMEM, pipelined grid.
    tb = _pick_batch_tile(b_sz)
    n_steps = pl.cdiv(b_sz, tb)
    b_pad = n_steps * tb
    if b_pad != b_sz:
        x_flat = jnp.pad(x_flat, ((0, b_pad - b_sz), (0, 0)))

    inv_num = 1.0 / params.num_models
    out_padded = None
    for single_buf in (True, False):
        try:
            call = _make_pallas_call(
                tb=tb, n_steps=n_steps, d=d, fused_w=fused_w, out_w=out_w,
                member_offsets=params.member_offsets,
                num_classes=params.num_classes, inv_num=inv_num,
                single_buffer_consts=single_buf)
            out_padded = jax.block_until_ready(
                call(x_flat, params.w_fused, params.b_fused, params.agg))
            break
        except Exception:
            if not single_buf:   # already on the fallback path -> re-raise
                raise
            # pl.Buffered(1) not accepted by this JAX version: retry with
            # default double-buffering (correctness identical).
            continue

    # Slice padded batch rows and padded class lanes back off.
    return out_padded[:b_sz, :params.num_classes]


# --------------------------------------------------------------------------- #
# Pure-JAX reference of the PyTorch ensemble_net.forward
# --------------------------------------------------------------------------- #
def reference_forward(x_nchw, weights, biases, matmul_dtype=jnp.float32):
    b_sz = x_nchw.shape[0]
    num_models = weights.shape[0]
    x_flat = x_nchw.reshape(b_sz, -1).astype(matmul_dtype)
    out = None
    for m in range(num_models):
        logits = jnp.dot(
            x_flat, weights[m].astype(matmul_dtype),
            preferred_element_type=jnp.float32,
        ) + biases[m]
        probs = jax.nn.softmax(logits, axis=1)
        out = probs if out is None else out + probs
    return out / num_models


if __name__ == "__main__":
    key = jax.random.PRNGKey(0)

    # Small shapes consistent with the module's forward (classifier on images).
    B, C, H, W = 2, 4, 16, 16          # input x: NCHW
    D = C * H * W                       # flattened feature dim = 1024
    NUM_CLASSES = 10                    # KMNIST has 10 classes
    NUM_MODELS = 3                      # ensemble of 3 pretrained members

    kx, kw, kb = jax.random.split(key, 3)
    x = jax.random.normal(kx, (B, C, H, W), dtype=jnp.float32)
    weights = 0.05 * jax.random.normal(
        kw, (NUM_MODELS, D, NUM_CLASSES), dtype=jnp.float32)
    biases = 0.1 * jax.random.normal(
        kb, (NUM_MODELS, 1, NUM_CLASSES), dtype=jnp.float32)

    # One-time weight packing (hoisted out of the per-call path), then forward.
    params = prepare_ensemble_params(weights, biases)
    out = ensemble_net_forward(x, params)
    out = jax.block_until_ready(out)
    assert out.shape == (B, NUM_CLASSES)

    # (1) Check against a reference with the same bf16-rounded matmul inputs
    #     (verifies kernel math; tolerance covers the approx reciprocal ~1e-3
    #     plus headroom for f32 MXU pass rounding in the scatter matmul).
    ref_bf16 = reference_forward(x, weights, biases, matmul_dtype=jnp.bfloat16)
    assert jnp.allclose(out, ref_bf16, atol=5e-3, rtol=0.0), "mismatch vs bf16 reference"

    # (2) Check against full fp32 module semantics (tolerance sized for bf16
    #     rounding of the matmul inputs).
    ref_f32 = reference_forward(x, weights, biases)
    assert jnp.allclose(out, ref_f32, atol=3e-2, rtol=0.0), "mismatch vs fp32 reference"

    # Averaged per-member softmax outputs must sum to ~1 per row.
    assert jnp.allclose(jnp.sum(out, axis=1), jnp.ones((B,)), atol=5e-3)

    print("KERNEL_OK")
</pallas_src>

<mosaic_0001>
module attributes {stable_mosaic.version = 11 : i64} {
  func.func @_ensemble_kernel(%arg0: i32, %arg1: memref<8x1024xf32, #tpu.memory_space<vmem>>, %arg2: memref<1024x128xbf16, #tpu.memory_space<vmem>>, %arg3: memref<1x128xf32, #tpu.memory_space<vmem>>, %arg4: memref<128x128xf32, #tpu.memory_space<vmem>>, %arg5: memref<8x128xf32, #tpu.memory_space<vmem>>) attributes {dimension_semantics = [#tpu.dimension_semantics<parallel>], iteration_bounds = array<i64: 1>, scalar_prefetch = 0 : i64, scratch_operands = 0 : i64, tpu.core_type = #tpu.core_type<tc>, window_params = [{transform_indices = @transform_0, window_bounds = array<i64: 8, 1024>}, {pipeline_mode = #tpu.pipeline_mode<synchronous>, transform_indices = @transform_1, window_bounds = array<i64: 1024, 128>}, {pipeline_mode = #tpu.pipeline_mode<synchronous>, transform_indices = @transform_2, window_bounds = array<i64: 1, 128>}, {pipeline_mode = #tpu.pipeline_mode<synchronous>, transform_indices = @transform_3, window_bounds = array<i64: 128, 128>}, {transform_indices = @transform_4, window_bounds = array<i64: 8, 128>}]} {
    %c0 = arith.constant 0 : index
    %c0_0 = arith.constant 0 : index
    %0 = vector.load %arg1[%c0, %c0_0] : memref<8x1024xf32, #tpu.memory_space<vmem>>, vector<8x1024xf32>
    %1 = arith.truncf %0 : vector<8x1024xf32> to vector<8x1024xbf16>
    %c0_1 = arith.constant 0 : index
    %c0_2 = arith.constant 0 : index
    %2 = vector.load %arg2[%c0_1, %c0_2] : memref<1024x128xbf16, #tpu.memory_space<vmem>>, vector<1024x128xbf16>
    %cst = arith.constant dense<0.000000e+00> : vector<8x128xf32>
    %3 = tpu.matmul %1, %2, %cst {dimension_numbers = #tpu.dot_dimension_numbers<[1], [0], [0], [1], [0, 0, 1, 1], [], []>} : vector<8x1024xbf16>, vector<1024x128xbf16>, vector<8x128xf32> -> vector<8x128xf32>
    %c0_3 = arith.constant 0 : index
    %c0_4 = arith.constant 0 : index
    %4 = vector.load %arg3[%c0_3, %c0_4] : memref<1x128xf32, #tpu.memory_space<vmem>>, vector<1x128xf32>
    %5 = vector.broadcast %4 : vector<1x128xf32> to vector<8x128xf32>
    %6 = arith.addf %3, %5 : vector<8x128xf32>
    %7 = tpu.iota {dimensions = array<i32: 1>} : vector<8x128xi32>
    %cst_5 = arith.constant 0.000000e+00 : f32
    %8 = vector.broadcast %cst_5 : f32 to vector<8x128xf32>
    %c0_i32 = arith.constant 0 : i32
    %9 = vector.broadcast %c0_i32 : i32 to vector<8x128xi32>
    %10 = arith.cmpi sge, %7, %9 : vector<8x128xi32>
    %c10_i32 = arith.constant 10 : i32
    %11 = vector.broadcast %c10_i32 : i32 to vector<8x128xi32>
    %12 = arith.cmpi slt, %7, %11 : vector<8x128xi32>
    %13 = arith.andi %10, %12 : vector<8x128xi1>
    %cst_6 = arith.constant -1.000000e+30 : f32
    %14 = vector.broadcast %cst_6 : f32 to vector<8x128xf32>
    %15 = arith.select %13, %6, %14 : vector<8x128xi1>, vector<8x128xf32>
    %cst_7 = arith.constant dense<0xFF800000> : vector<8xf32>
    %16 = vector.multi_reduction <maximumf>, %15, %cst_7 [1] : vector<8x128xf32> to vector<8xf32>
    %17 = vector.shape_cast %16 : vector<8xf32> to vector<8x1xf32>
    %18 = vector.broadcast %17 : vector<8x1xf32> to vector<8x128xf32>
    %19 = arith.subf %15, %18 : vector<8x128xf32>
    %20 = math.exp %19 : vector<8x128xf32>
    %cst_8 = arith.constant dense<0.000000e+00> : vector<8xf32>
    %21 = vector.multi_reduction <add>, %20, %cst_8 [1] : vector<8x128xf32> to vector<8xf32>
    %22 = vector.shape_cast %21 : vector<8xf32> to vector<8x1xf32>
    %23 = tpu.reciprocal %22 {approx = true} : vector<8x1xf32> -> vector<8x1xf32>
    %cst_9 = arith.constant 0.333333343 : f32
    %24 = vector.broadcast %cst_9 : f32 to vector<8x1xf32>
    %25 = arith.mulf %23, %24 : vector<8x1xf32>
    %26 = vector.broadcast %25 : vector<8x1xf32> to vector<8x128xf32>
    %27 = arith.mulf %20, %26 : vector<8x128xf32>
    %28 = arith.addf %8, %27 : vector<8x128xf32>
    %c10_i32_10 = arith.constant 10 : i32
    %29 = vector.broadcast %c10_i32_10 : i32 to vector<8x128xi32>
    %30 = arith.cmpi sge, %7, %29 : vector<8x128xi32>
    %c20_i32 = arith.constant 20 : i32
    %31 = vector.broadcast %c20_i32 : i32 to vector<8x128xi32>
    %32 = arith.cmpi slt, %7, %31 : vector<8x128xi32>
    %33 = arith.andi %30, %32 : vector<8x128xi1>
    %cst_11 = arith.constant -1.000000e+30 : f32
    %34 = vector.broadcast %cst_11 : f32 to vector<8x128xf32>
    %35 = arith.select %33, %6, %34 : vector<8x128xi1>, vector<8x128xf32>
    %cst_12 = arith.constant dense<0xFF800000> : vector<8xf32>
    %36 = vector.multi_reduction <maximumf>, %35, %cst_12 [1] : vector<8x128xf32> to vector<8xf32>
    %37 = vector.shape_cast %36 : vector<8xf32> to vector<8x1xf32>
    %38 = vector.broadcast %37 : vector<8x1xf32> to vector<8x128xf32>
    %39 = arith.subf %35, %38 : vector<8x128xf32>
    %40 = math.exp %39 : vector<8x128xf32>
    %cst_13 = arith.constant dense<0.000000e+00> : vector<8xf32>
    %41 = vector.multi_reduction <add>, %40, %cst_13 [1] : vector<8x128xf32> to vector<8xf32>
    %42 = vector.shape_cast %41 : vector<8xf32> to vector<8x1xf32>
    %43 = tpu.reciprocal %42 {approx = true} : vector<8x1xf32> -> vector<8x1xf32>
    %cst_14 = arith.constant 0.333333343 : f32
    %44 = vector.broadcast %cst_14 : f32 to vector<8x1xf32>
    %45 = arith.mulf %43, %44 : vector<8x1xf32>
    %46 = vector.broadcast %45 : vector<8x1xf32> to vector<8x128xf32>
    %47 = arith.mulf %40, %46 : vector<8x128xf32>
    %48 = arith.addf %28, %47 : vector<8x128xf32>
    %c20_i32_15 = arith.constant 20 : i32
    %49 = vector.broadcast %c20_i32_15 : i32 to vector<8x128xi32>
    %50 = arith.cmpi sge, %7, %49 : vector<8x128xi32>
    %c30_i32 = arith.constant 30 : i32
    %51 = vector.broadcast %c30_i32 : i32 to vector<8x128xi32>
    %52 = arith.cmpi slt, %7, %51 : vector<8x128xi32>
    %53 = arith.andi %50, %52 : vector<8x128xi1>
    %cst_16 = arith.constant -1.000000e+30 : f32
    %54 = vector.broadcast %cst_16 : f32 to vector<8x128xf32>
    %55 = arith.select %53, %6, %54 : vector<8x128xi1>, vector<8x128xf32>
    %cst_17 = arith.constant dense<0xFF800000> : vector<8xf32>
    %56 = vector.multi_reduction <maximumf>, %55, %cst_17 [1] : vector<8x128xf32> to vector<8xf32>
    %57 = vector.shape_cast %56 : vector<8xf32> to vector<8x1xf32>
    %58 = vector.broadcast %57 : vector<8x1xf32> to vector<8x128xf32>
    %59 = arith.subf %55, %58 : vector<8x128xf32>
    %60 = math.exp %59 : vector<8x128xf32>
    %cst_18 = arith.constant dense<0.000000e+00> : vector<8xf32>
    %61 = vector.multi_reduction <add>, %60, %cst_18 [1] : vector<8x128xf32> to vector<8xf32>
    %62 = vector.shape_cast %61 : vector<8xf32> to vector<8x1xf32>
    %63 = tpu.reciprocal %62 {approx = true} : vector<8x1xf32> -> vector<8x1xf32>
    %cst_19 = arith.constant 0.333333343 : f32
    %64 = vector.broadcast %cst_19 : f32 to vector<8x1xf32>
    %65 = arith.mulf %63, %64 : vector<8x1xf32>
    %66 = vector.broadcast %65 : vector<8x1xf32> to vector<8x128xf32>
    %67 = arith.mulf %60, %66 : vector<8x128xf32>
    %68 = arith.addf %48, %67 : vector<8x128xf32>
    %c0_20 = arith.constant 0 : index
    %c0_21 = arith.constant 0 : index
    %69 = vector.load %arg4[%c0_20, %c0_21] : memref<128x128xf32, #tpu.memory_space<vmem>>, vector<128x128xf32>
    %cst_22 = arith.constant dense<0.000000e+00> : vector<8x128xf32>
    %70 = tpu.matmul %68, %69, %cst_22 {dimension_numbers = #tpu.dot_dimension_numbers<[1], [0], [0], [1], [0, 0, 1, 1], [], []>} : vector<8x128xf32>, vector<128x128xf32>, vector<8x128xf32> -> vector<8x128xf32>
    %c0_23 = arith.constant 0 : index
    %c0_24 = arith.constant 0 : index
    %71 = vector.load %arg5[%c0_23, %c0_24] : memref<8x128xf32, #tpu.memory_space<vmem>>, vector<8x128xf32>
    tpu.vector_store %arg5[%c0_23, %c0_24], %70 {strides = array<i32>} : memref<8x128xf32, #tpu.memory_space<vmem>>, vector<8x128xf32>,
    return
  }
  func.func @transform_0(%arg0: i32) -> (i32, i32) {
    %c0_i32 = arith.constant 0 : i32
    %c0_i32_0 = arith.constant 0 : i32
    return %arg0, %c0_i32 : i32, i32
  }
  func.func @transform_1(%arg0: i32) -> (i32, i32) {
    %c0_i32 = arith.constant 0 : i32
    %c0_i32_0 = arith.constant 0 : i32
    %c0_i32_1 = arith.constant 0 : i32
    return %c0_i32, %c0_i32_0 : i32, i32
  }
  func.func @transform_2(%arg0: i32) -> (i32, i32) {
    %c0_i32 = arith.constant 0 : i32
    %c0_i32_0 = arith.constant 0 : i32
    %c0_i32_1 = arith.constant 0 : i32
    return %c0_i32, %c0_i32_0 : i32, i32
  }
  func.func @transform_3(%arg0: i32) -> (i32, i32) {
    %c0_i32 = arith.constant 0 : i32
    %c0_i32_0 = arith.constant 0 : i32
    %c0_i32_1 = arith.constant 0 : i32
    return %c0_i32, %c0_i32_0 : i32, i32
  }
  func.func @transform_4(%arg0: i32) -> (i32, i32) {
    %c0_i32 = arith.constant 0 : i32
    %c0_i32_0 = arith.constant 0 : i32
    return %arg0, %c0_i32 : i32, i32
  }
}

module attributes {stable_mosaic.version = 11 : i64} {
  func.func @_ensemble_kernel(%arg0: i32, %arg1: memref<8x1024xf32, #tpu.memory_space<vmem>>, %arg2: memref<1024x128xbf16, #tpu.memory_space<vmem>>, %arg3: memref<1x128xf32, #tpu.memory_space<vmem>>, %arg4: memref<128x128xf32, #tpu.memory_space<vmem>>, %arg5: memref<8x128xf32, #tpu.memory_space<vmem>>) attributes {dimension_semantics = [#tpu.dimension_semantics<parallel>], iteration_bounds = array<i64: 1>, scalar_prefetch = 0 : i64, scratch_operands = 0 : i64, tpu.core_type = #tpu.core_type<tc>, window_params = [{transform_indices = @transform_0, window_bounds = array<i64: 8, 1024>}, {pipeline_mode = #tpu.pipeline_mode<synchronous>, transform_indices = @transform_1, window_bounds = array<i64: 1024, 128>}, {pipeline_mode = #tpu.pipeline_mode<synchronous>, transform_indices = @transform_2, window_bounds = array<i64: 1, 128>}, {pipeline_mode = #tpu.pipeline_mode<synchronous>, transform_indices = @transform_3, window_bounds = array<i64: 128, 128>}, {transform_indices = @transform_4, window_bounds = array<i64: 8, 128>}]} {
    %c0 = arith.constant 0 : index
    %c0_0 = arith.constant 0 : index
    %0 = vector.load %arg1[%c0, %c0_0] : memref<8x1024xf32, #tpu.memory_space<vmem>>, vector<8x1024xf32>
    %1 = arith.truncf %0 : vector<8x1024xf32> to vector<8x1024xbf16>
    %c0_1 = arith.constant 0 : index
    %c0_2 = arith.constant 0 : index
    %2 = vector.load %arg2[%c0_1, %c0_2] : memref<1024x128xbf16, #tpu.memory_space<vmem>>, vector<1024x128xbf16>
    %cst = arith.constant dense<0.000000e+00> : vector<8x128xf32>
    %3 = tpu.matmul %1, %2, %cst {dimension_numbers = #tpu.dot_dimension_numbers<[1], [0], [0], [1], [0, 0, 1, 1], [], []>} : vector<8x1024xbf16>, vector<1024x128xbf16>, vector<8x128xf32> -> vector<8x128xf32>
    %c0_3 = arith.constant 0 : index
    %c0_4 = arith.constant 0 : index
    %4 = vector.load %arg3[%c0_3, %c0_4] : memref<1x128xf32, #tpu.memory_space<vmem>>, vector<1x128xf32>
    %5 = vector.broadcast %4 : vector<1x128xf32> to vector<8x128xf32>
    %6 = arith.addf %3, %5 : vector<8x128xf32>
    %7 = tpu.iota {dimensions = array<i32: 1>} : vector<8x128xi32>
    %cst_5 = arith.constant 0.000000e+00 : f32
    %8 = vector.broadcast %cst_5 : f32 to vector<8x128xf32>
    %c0_i32 = arith.constant 0 : i32
    %9 = vector.broadcast %c0_i32 : i32 to vector<8x128xi32>
    %10 = arith.cmpi sge, %7, %9 : vector<8x128xi32>
    %c10_i32 = arith.constant 10 : i32
    %11 = vector.broadcast %c10_i32 : i32 to vector<8x128xi32>
    %12 = arith.cmpi slt, %7, %11 : vector<8x128xi32>
    %13 = arith.andi %10, %12 : vector<8x128xi1>
    %cst_6 = arith.constant -1.000000e+30 : f32
    %14 = vector.broadcast %cst_6 : f32 to vector<8x128xf32>
    %15 = arith.select %13, %6, %14 : vector<8x128xi1>, vector<8x128xf32>
    %cst_7 = arith.constant dense<0xFF800000> : vector<8xf32>
    %16 = vector.multi_reduction <maximumf>, %15, %cst_7 [1] : vector<8x128xf32> to vector<8xf32>
    %17 = vector.shape_cast %16 : vector<8xf32> to vector<8x1xf32>
    %18 = vector.broadcast %17 : vector<8x1xf32> to vector<8x128xf32>
    %19 = arith.subf %15, %18 : vector<8x128xf32>
    %20 = math.exp %19 : vector<8x128xf32>
    %cst_8 = arith.constant dense<0.000000e+00> : vector<8xf32>
    %21 = vector.multi_reduction <add>, %20, %cst_8 [1] : vector<8x128xf32> to vector<8xf32>
    %22 = vector.shape_cast %21 : vector<8xf32> to vector<8x1xf32>
    %23 = tpu.reciprocal %22 {approx = true} : vector<8x1xf32> -> vector<8x1xf32>
    %cst_9 = arith.constant 0.333333343 : f32
    %24 = vector.broadcast %cst_9 : f32 to vector<8x1xf32>
    %25 = arith.mulf %23, %24 : vector<8x1xf32>
    %26 = vector.broadcast %25 : vector<8x1xf32> to vector<8x128xf32>
    %27 = arith.mulf %20, %26 : vector<8x128xf32>
    %28 = arith.addf %8, %27 : vector<8x128xf32>
    %c10_i32_10 = arith.constant 10 : i32
    %29 = vector.broadcast %c10_i32_10 : i32 to vector<8x128xi32>
    %30 = arith.cmpi sge, %7, %29 : vector<8x128xi32>
    %c20_i32 = arith.constant 20 : i32
    %31 = vector.broadcast %c20_i32 : i32 to vector<8x128xi32>
    %32 = arith.cmpi slt, %7, %31 : vector<8x128xi32>
    %33 = arith.andi %30, %32 : vector<8x128xi1>
    %cst_11 = arith.constant -1.000000e+30 : f32
    %34 = vector.broadcast %cst_11 : f32 to vector<8x128xf32>
    %35 = arith.select %33, %6, %34 : vector<8x128xi1>, vector<8x128xf32>
    %cst_12 = arith.constant dense<0xFF800000> : vector<8xf32>
    %36 = vector.multi_reduction <maximumf>, %35, %cst_12 [1] : vector<8x128xf32> to vector<8xf32>
    %37 = vector.shape_cast %36 : vector<8xf32> to vector<8x1xf32>
    %38 = vector.broadcast %37 : vector<8x1xf32> to vector<8x128xf32>
    %39 = arith.subf %35, %38 : vector<8x128xf32>
    %40 = math.exp %39 : vector<8x128xf32>
    %cst_13 = arith.constant dense<0.000000e+00> : vector<8xf32>
    %41 = vector.multi_reduction <add>, %40, %cst_13 [1] : vector<8x128xf32> to vector<8xf32>
    %42 = vector.shape_cast %41 : vector<8xf32> to vector<8x1xf32>
    %43 = tpu.reciprocal %42 {approx = true} : vector<8x1xf32> -> vector<8x1xf32>
    %cst_14 = arith.constant 0.333333343 : f32
    %44 = vector.broadcast %cst_14 : f32 to vector<8x1xf32>
    %45 = arith.mulf %43, %44 : vector<8x1xf32>
    %46 = vector.broadcast %45 : vector<8x1xf32> to vector<8x128xf32>
    %47 = arith.mulf %40, %46 : vector<8x128xf32>
    %48 = arith.addf %28, %47 : vector<8x128xf32>
    %c20_i32_15 = arith.constant 20 : i32
    %49 = vector.broadcast %c20_i32_15 : i32 to vector<8x128xi32>
    %50 = arith.cmpi sge, %7, %49 : vector<8x128xi32>
    %c30_i32 = arith.constant 30 : i32
    %51 = vector.broadcast %c30_i32 : i32 to vector<8x128xi32>
    %52 = arith.cmpi slt, %7, %51 : vector<8x128xi32>
    %53 = arith.andi %50, %52 : vector<8x128xi1>
    %cst_16 = arith.constant -1.000000e+30 : f32
    %54 = vector.broadcast %cst_16 : f32 to vector<8x128xf32>
    %55 = arith.select %53, %6, %54 : vector<8x128xi1>, vector<8x128xf32>
    %cst_17 = arith.constant dense<0xFF800000> : vector<8xf32>
    %56 = vector.multi_reduction <maximumf>, %55, %cst_17 [1] : vector<8x128xf32> to vector<8xf32>
    %57 = vector.shape_cast %56 : vector<8xf32> to vector<8x1xf32>
    %58 = vector.broadcast %57 : vector<8x1xf32> to vector<8x128xf32>
    %59 = arith.subf %55, %58 : vector<8x128xf32>
    %60 = math.exp %59 : vector<8x128xf32>
    %cst_18 = arith.constant dense<0.000000e+00> : vector<8xf32>
    %61 = vector.multi_reduction <add>, %60, %cst_18 [1] : vector<8x128xf32> to vector<8xf32>
    %62 = vector.shape_cast %61 : vector<8xf32> to vector<8x1xf32>
    %63 = tpu.reciprocal %62 {approx = true} : vector<8x1xf32> -> vector<8x1xf32>
    %cst_19 = arith.constant 0.333333343 : f32
    %64 = vector.broadcast %cst_19 : f32 to vector<8x1xf32>
    %65 = arith.mulf %63, %64 : vector<8x1xf32>
    %66 = vector.broadcast %65 : vector<8x1xf32> to vector<8x128xf32>
    %67 = arith.mulf %60, %66 : vector<8x128xf32>
    %68 = arith.addf %48, %67 : vector<8x128xf32>
    %c0_20 = arith.constant 0 : index
    %c0_21 = arith.constant 0 : index
    %69 = vector.load %arg4[%c0_20, %c0_21] : memref<128x128xf32, #tpu.memory_space<vmem>>, vector<128x128xf32>
    %cst_22 = arith.constant dense<0.000000e+00> : vector<8x128xf32>
    %70 = tpu.matmul %68, %69, %cst_22 {dimension_numbers = #tpu.dot_dimension_numbers<[1], [0], [0], [1], [0, 0, 1, 1], [], []>} : vector<8x128xf32>, vector<128x128xf32>, vector<8x128xf32> -> vector<8x128xf32>
    %c0_23 = arith.constant 0 : index
    %c0_24 = arith.constant 0 : index
    %71 = vector.load %arg5[%c0_23, %c0_24] : memref<8x128xf32, #tpu.memory_space<vmem>>, vector<8x128xf32>
    tpu.vector_store %arg5[%c0_23, %c0_24], %70 {strides = array<i32>} : memref<8x128xf32, #tpu.memory_space<vmem>>, vector<8x128xf32>,
    return
  }
  func.func @transform_0(%arg0: i32) -> (i32, i32) {
    %c0_i32 = arith.constant 0 : i32
    %c0_i32_0 = arith.constant 0 : i32
    return %arg0, %c0_i32 : i32, i32
  }
  func.func @transform_1(%arg0: i32) -> (i32, i32) {
    %c0_i32 = arith.constant 0 : i32
    %c0_i32_0 = arith.constant 0 : i32
    %c0_i32_1 = arith.constant 0 : i32
    return %c0_i32, %c0_i32_0 : i32, i32
  }
  func.func @transform_2(%arg0: i32) -> (i32, i32) {
    %c0_i32 = arith.constant 0 : i32
    %c0_i32_0 = arith.constant 0 : i32
    %c0_i32_1 = arith.constant 0 : i32
    return %c0_i32, %c0_i32_0 : i32, i32
  }
  func.func @transform_3(%arg0: i32) -> (i32, i32) {
    %c0_i32 = arith.constant 0 : i32
    %c0_i32_0 = arith.constant 0 : i32
    %c0_i32_1 = arith.constant 0 : i32
    return %c0_i32, %c0_i32_0 : i32, i32
  }
  func.func @transform_4(%arg0: i32) -> (i32, i32) {
    %c0_i32 = arith.constant 0 : i32
    %c0_i32_0 = arith.constant 0 : i32
    return %arg0, %c0_i32 : i32, i32
  }
}

</mosaic_0001>

<bundles_post_ra>
// kernel: tpu_custom_call.1
= control target key start
LH: loop header
LB: loop body
LE: loop exit
PB: predicated region body
PF: predicated region fallthrough
CT: control target
= control target key end

     0   :  { %9 = vsyncpa [#allocation3], 0  ;;  %s1400_s0 = inlined_call_operand.hbm [shape: f32[8,1024], index: 0, kind: input, shape index: {}]   ;;  %s1401_s1 = inlined_call_operand.hbm [shape: bf16[1024,128], index: 1, kind: input, shape index: {}]   ;;  %s1402_s2 = inlined_call_operand.vmem [shape: f32[1,128], index: 2, kind: input, shape index: {}]   ;;  %s1403_s3 = inlined_call_operand.hbm [shape: f32[128,128], index: 3, kind: input, shape index: {}]   ;;  %s1404_s4 = inlined_call_operand.hbm [shape: f32[8,128], index: 4, kind: output, shape index: {}]  }
   0x1   :  { %10 = vsyncpa [#allocation6], 0 }
   0x2   :  { %11 = vsyncpa [#allocation4], 0  ;;  %s1313_s15 = smov [#allocation5]   ;;  %s1219_s19 = scalar_lea.hbm %s1401_s1, 8192 }
   0x3   :  { %s27_s16 = sshll.u32 %s1313_s15, 4  ;;  %p1220_p0 = scmp.ne.s32.totalorder %s1401_s1, %s1219_s19  ;;  %s28_s16 = int_to_ptr.vmem [resolvable:$true] %s27_s16 }
   0x4   :  { %p1223_p1 = scmp.lt.u32.totalorder %s1219_s19, %s1401_s1 }
   0x6   :  { %p1225_p2 = pnand %p1223_p1, %p1220_p0 }
   0x8   :  { %1228 = shalt.err (!%p1225_p2)
}
   0x9   :  { %s1229_s24 = scalar_lea.vmem %s28_s16, 8192  ;;  %p1234_p4 = scmp.lt.s32.totalorder %s28_s16, %s28_s16 }
   0xa   :  { %p1230_p3 = scmp.ne.s32.totalorder %s28_s16, %s1229_s24  ;;  %p1235_p5 = scmp.lt.s32.totalorder %s1229_s24, %s1229_s24 }
   0xc   :  { %p1236_p6 = por %p1235_p5, %p1234_p4 }
   0xe   :  { %p1237_p7 = pnand %p1236_p6, %p1230_p3 }
  0x10   :  { %1240 = shalt.err (!%p1237_p7)
}
  0x11   :  { %s1314_s25 = smov 64   ;;  %s1315_s26 = smov 4  }
  0x12   :  { %33 = dma.hbm_to_vmem [thread:$0]  %s1401_s1, 8192, %s28_s16, [#allocation6], %s1314_s25, %s1314_s25, %s1315_s26  }
  0x13   :  { %s1316_s29 = smov [#allocation2]   ;;  %s1317_s5 = smov [#allocation7]  }
  0x14   :  { %s18_s30 = sshll.u32 %s1316_s29, 4  ;;  %s41_s6 = sshll.u32 %s1317_s5, 4  ;;  %s19_s30 = int_to_ptr.vmem [resolvable:$true] %s18_s30  ;;  %s42_s6 = int_to_ptr.vmem [resolvable:$true] %s41_s6 }
  0x15   :  { %s1241_s9 = scalar_lea.hbm %s1400_s0, 1024 }
  0x16   :  { %p1242_p8 = scmp.ne.s32.totalorder %s1400_s0, %s1241_s9  ;;  %p1245_p9 = scmp.lt.u32.totalorder %s1241_s9, %s1400_s0 }
  0x18   :  { %p1247_p10 = pnand %p1245_p9, %p1242_p8 }
  0x1a   :  { %1250 = shalt.err (!%p1247_p10)
}
  0x1b   :  { %s1251_s1 = scalar_lea.vmem %s19_s30, 1024  ;;  %p1256_p12 = scmp.lt.s32.totalorder %s19_s30, %s19_s30 }
  0x1c   :  { %p1252_p11 = scmp.ne.s32.totalorder %s19_s30, %s1251_s1  ;;  %p1257_p13 = scmp.lt.s32.totalorder %s1251_s1, %s1251_s1 }
  0x1e   :  { %p1258_p0 = por %p1257_p13, %p1256_p12 }
  0x20   :  { %p1259_p1 = pnand %p1258_p0, %p1252_p11 }
  0x22   :  { %1262 = shalt.err (!%p1259_p1)
}
  0x23   :  { %21 = dma.hbm_to_vmem [thread:$0]  %s1400_s0, 1024, %s19_s30, [#allocation3]  }
  0x24   :  { %s1263_s18 = scalar_lea.hbm %s1403_s3, 2048 }
  0x25   :  { %p1264_p2 = scmp.ne.s32.totalorder %s1403_s3, %s1263_s18  ;;  %p1267_p3 = scmp.lt.u32.totalorder %s1263_s18, %s1403_s3 }
  0x27   :  { %p1269_p4 = pnand %p1267_p3, %p1264_p2 }
  0x29   :  { %1272 = shalt.err (!%p1269_p4)
}
  0x2a   :  { %s1273_s23 = scalar_lea.vmem %s42_s6, 2048  ;;  %p1278_p6 = scmp.lt.s32.totalorder %s42_s6, %s42_s6 }
  0x2b   :  { %p1274_p5 = scmp.ne.s32.totalorder %s42_s6, %s1273_s23  ;;  %p1279_p7 = scmp.lt.s32.totalorder %s1273_s23, %s1273_s23 }
  0x2d   :  { %p1280_p8 = por %p1279_p7, %p1278_p6 }
  0x2f   :  { %p1281_p9 = pnand %p1280_p8, %p1274_p5 }
  0x31   :  { %1284 = shalt.err (!%p1281_p9)
}
  0x32   :  { %s1318_s0 = smov 128   ;;  %s1319_s24 = smov 8  }
  0x33   :  { %47 = dma.hbm_to_vmem [thread:$0]  %s1403_s3, 2048, %s42_s6, [#allocation6], %s1318_s0, %s1318_s0, %s1319_s24  }
  0x34   :  { %1307 = dma.done.wait [#allocation3], 1024  }
  0x35   :  { %1308 = vsyncadd [#allocation3], 4294966272 }
  0x36   :  { %1309 = dma.done.wait [#allocation6], 10240  }
  0x37   :  { %1310 = vsyncadd [#allocation6], 4294957056  ;;  %v1143_v0 = vld [vmem:[#allocation5 + $0x40] sm:$0xff]   ;;  %v1147_v4 = vld [vmem:[#allocation5 + $0x48] sm:$0xff]   ;;  %vm1321_vm7 = vmmov 0  }
  0x38   :  { %v1144_v1 = vld [vmem:[#allocation5 + $0xc0] sm:$0xff]   ;;  %968 = vmatprep.subr.bf16.mxu0 %v1143_v0  ;;  %v1148_v5 = vld [vmem:[#allocation5 + $0xc8] sm:$0xff]   ;;  %v1151_v8 = vld [vmem:[#allocation5 + $0x50] sm:$0xff]  }
  0x39   :  { %v1145_v2 = vld [vmem:[#allocation5] sm:$0xff]   ;;  %990 = vmatprep.subr.bf16.mxu1 %v1144_v1  ;;  %v1149_v6 = vld [vmem:[#allocation5 + $0x8] sm:$0xff]   ;;  %v1152_v9 = vld [vmem:[#allocation5 + $0xd0] sm:$0xff]  }
  0x3a   :  { %v1146_v3 = vld [vmem:[#allocation5 + $0x80] sm:$0xff]   ;;  %969 = vmatpush3.bf16.msra.mxu0 %v1145_v2  ;;  %v1150_v7 = vld [vmem:[#allocation5 + $0x88] sm:$0xff]   ;;  %v1153_v10 = vld [vmem:[#allocation5 + $0x10] sm:$0xff]  }
  0x3b   :  { %991 = vmatpush3.bf16.msra.mxu1 %v1146_v3  ;;  %970 = vmatprep.subr.bf16.mxu0 %v1147_v4  ;;  %v1154_v11 = vld [vmem:[#allocation5 + $0x90] sm:$0xff]   ;;  %v1155_v12 = vld [vmem:[#allocation5 + $0x58] sm:$0xff]   ;;  %v1159_v16 = vld [vmem:[#allocation5 + $0x60] sm:$0xff]  }
  0x3c   :  { %992 = vmatprep.subr.bf16.mxu1 %v1148_v5  ;;  %v1156_v13 = vld [vmem:[#allocation5 + $0xd8] sm:$0xff]   ;;  %v1160_v17 = vld [vmem:[#allocation5 + $0xe0] sm:$0xff]   ;;  %v1163_v20 = vld [vmem:[#allocation5 + $0x68] sm:$0xff]  }
  0x3d   :  { %v1157_v14 = vld [vmem:[#allocation5 + $0x18] sm:$0xff]   ;;  %v1161_v18 = vld [vmem:[#allocation5 + $0x20] sm:$0xff]   ;;  %v1164_v21 = vld [vmem:[#allocation5 + $0xe8] sm:$0xff]  }
  0x3e   :  { %971 = vmatpush3.bf16.msra.mxu0 %v1149_v6  ;;  %v1158_v15 = vld [vmem:[#allocation5 + $0x98] sm:$0xff]   ;;  %v1162_v19 = vld [vmem:[#allocation5 + $0xa0] sm:$0xff]   ;;  %v1165_v22 = vld [vmem:[#allocation5 + $0x28] sm:$0xff]  }
  0x3f   :  { %993 = vmatpush3.bf16.msra.mxu1 %v1150_v7  ;;  %972 = vmatprep.subr.bf16.mxu0 %v1151_v8  ;;  %v1166_v23 = vld [vmem:[#allocation5 + $0xa8] sm:$0xff]   ;;  %v1167_v24 = vld [vmem:[#allocation5 + $0x70] sm:$0xff]   ;;  %v1171_v28 = vld [vmem:[#allocation5 + $0x78] sm:$0xff]  }
  0x40   :  { %994 = vmatprep.subr.bf16.mxu1 %v1152_v9  ;;  %v1168_v25 = vld [vmem:[#allocation5 + $0xf0] sm:$0xff]   ;;  %v1172_v29 = vld [vmem:[#allocation5 + $0xf8] sm:$0xff]   ;;  %v59_v32 = vld [vmem:[#allocation2 + $0x8] sm:$0xff] }
  0x41   :  { %v1169_v26 = vld [vmem:[#allocation5 + $0x30] sm:$0xff]   ;;  %v1173_v30 = vld [vmem:[#allocation5 + $0x38] sm:$0xff]   ;;  %v58_v34 = vld [vmem:[#allocation2] sm:$0xff]  ;;  %v67_v35 = vpack.c.bf16 %v59_v32, %v59_v32 }
  0x42   :  { %973 = vmatpush3.bf16.msra.mxu0 %v1153_v10  ;;  %v1170_v27 = vld [vmem:[#allocation5 + $0xb0] sm:$0xff]   ;;  %v1174_v31 = vld [vmem:[#allocation5 + $0xb8] sm:$0xff]   ;;  %v66_v37 = vpack.c.bf16 %v58_v34, %v58_v34  ;;  %v1175_v40 = vld [vmem:[#allocation5 + $0x140] sm:$0xff]  }
  0x43   :  { %995 = vmatpush3.bf16.msra.mxu1 %v1154_v11  ;;  %974 = vmatprep.subr.bf16.mxu0 %v1155_v12  ;;  %v61_v33 = vld [vmem:[#allocation2 + $0x18] sm:$0xff]  ;;  %v60_v38 = vld [vmem:[#allocation2 + $0x10] sm:$0xff]  ;;  %v1176_v41 = vld [vmem:[#allocation5 + $0x1c0] sm:$0xff]  }
  0x44   :  { %996 = vmatprep.subr.bf16.mxu1 %v1156_v13  ;;  %v69_v36 = vpack.c.bf16 %v61_v33, %v61_v33  ;;  %v68_v39 = vpack.c.bf16 %v60_v38, %v60_v38  ;;  %625 = vmatprep.mubr.bf16.mxu0 %v67_v35  ;;  %v1177_v42 = vld [vmem:[#allocation5 + $0x100] sm:$0xff]   ;;  %v1179_v44 = vld [vmem:[#allocation5 + $0x148] sm:$0xff]   ;;  %v1183_v48 = vld [vmem:[#allocation5 + $0x150] sm:$0xff]  }
  0x45   :  { %v1178_v43 = vld [vmem:[#allocation5 + $0x180] sm:$0xff]   ;;  %v1180_v45 = vld [vmem:[#allocation5 + $0x1c8] sm:$0xff]   ;;  %v1184_v49 = vld [vmem:[#allocation5 + $0x1d0] sm:$0xff]  }
  0x46   :  { %975 = vmatpush3.bf16.msra.mxu0 %v1157_v14  ;;  %665 = vmatprep.mubr.bf16.mxu1 %v69_v36  ;;  %v1181_v46 = vld [vmem:[#allocation5 + $0x108] sm:$0xff]   ;;  %v1185_v50 = vld [vmem:[#allocation5 + $0x110] sm:$0xff]   ;;  %v1187_v52 = vld [vmem:[#allocation5 + $0x158] sm:$0xff]  }
  0x47   :  { %997 = vmatpush3.bf16.msra.mxu1 %v1158_v15  ;;  %976 = vmatprep.subr.bf16.mxu0 %v1159_v16  ;;  %v1182_v47 = vld [vmem:[#allocation5 + $0x188] sm:$0xff]   ;;  %v1186_v51 = vld [vmem:[#allocation5 + $0x190] sm:$0xff]   ;;  %v1188_v53 = vld [vmem:[#allocation5 + $0x1d8] sm:$0xff]  }
  0x48   :  { %998 = vmatprep.subr.bf16.mxu1 %v1160_v17  ;;  %v1189_v54 = vld [vmem:[#allocation5 + $0x118] sm:$0xff]   ;;  %v1191_v56 = vld [vmem:[#allocation5 + $0x160] sm:$0xff]   ;;  %v1195_v60 = vld [vmem:[#allocation5 + $0x168] sm:$0xff]  }
  0x49   :  { %v1190_v55 = vld [vmem:[#allocation5 + $0x198] sm:$0xff]   ;;  %v1192_v57 = vld [vmem:[#allocation5 + $0x1e0] sm:$0xff]   ;;  %v1196_v61 = vld [vmem:[#allocation5 + $0x1e8] sm:$0xff]  }
  0x4a   :  { %977 = vmatpush3.bf16.msra.mxu0 %v1161_v18  ;;  %v1193_v58 = vld [vmem:[#allocation5 + $0x120] sm:$0xff]   ;;  %v1197_v62 = vld [vmem:[#allocation5 + $0x128] sm:$0xff]   ;;  %v1199_v0 = vld [vmem:[#allocation5 + $0x170] sm:$0xff]  }
  0x4b   :  { %999 = vmatpush3.bf16.msra.mxu1 %v1162_v19  ;;  %978 = vmatprep.subr.bf16.mxu0 %v1163_v20  ;;  %v1194_v59 = vld [vmem:[#allocation5 + $0x1a0] sm:$0xff]   ;;  %v1198_v63 = vld [vmem:[#allocation5 + $0x1a8] sm:$0xff]   ;;  %v1200_v1 = vld [vmem:[#allocation5 + $0x1f0] sm:$0xff]  }
  0x4c   :  { %1000 = vmatprep.subr.bf16.mxu1 %v1164_v21  ;;  %v1201_v2 = vld [vmem:[#allocation5 + $0x130] sm:$0xff]   ;;  %v1203_v4 = vld [vmem:[#allocation5 + $0x178] sm:$0xff]   ;;  %v63_v8 = vld [vmem:[#allocation2 + $0x28] sm:$0xff] }
  0x4d   :  { %v1202_v3 = vld [vmem:[#allocation5 + $0x1b0] sm:$0xff]   ;;  %v1204_v5 = vld [vmem:[#allocation5 + $0x1f8] sm:$0xff]   ;;  %v71_v10 = vpack.c.bf16 %v63_v8, %v63_v8  ;;  %v62_v12 = vld [vmem:[#allocation2 + $0x20] sm:$0xff] }
  0x4e   :  { %979 = vmatpush3.bf16.msra.mxu0 %v1165_v22  ;;  %v1205_v6 = vld [vmem:[#allocation5 + $0x138] sm:$0xff]   ;;  %v64_v13 = vld [vmem:[#allocation2 + $0x30] sm:$0xff]  ;;  %v70_v14 = vpack.c.bf16 %v62_v12, %v62_v12  ;;  %v903_v18 = vld [vmem:[%s1402_s2] ss:$0 sm:$0xff]  ;;  %s1323_s2 = smov [#allocation8]  }
  0x4f   :  { %1001 = vmatpush3.bf16.msra.mxu1 %v1166_v23  ;;  %980 = vmatprep.subr.bf16.mxu0 %v1167_v24  ;;  %v1206_v7 = vld [vmem:[#allocation5 + $0x1b8] sm:$0xff]   ;;  %v72_v15 = vpack.c.bf16 %v64_v13, %v64_v13  ;;  %v809_v8 = vld [vmem:[#allocation7 + $0x48] sm:$0xff]  ;;  %v812_v13 = vld [vmem:[#allocation7 + $0x60] sm:$0xff]  ;;  %s893_s28 = sshll.u32 %s1323_s2, 4  ;;  %s894_s28 = int_to_ptr.vmem [resolvable:$true] %s893_s28 }
  0x50   :  { %1002 = vmatprep.subr.bf16.mxu1 %v1168_v25  ;;  %v65_v9 = vld [vmem:[#allocation2 + $0x38] sm:$0xff]  ;;  %s1285_s29 = scalar_lea.vmem %s894_s28, 128  ;;  %p1290_p11 = scmp.lt.s32.totalorder %s894_s28, %s894_s28 }
  0x51   :  { %v73_v11 = vpack.c.bf16 %v65_v9, %v65_v9  ;;  %p1286_p10 = scmp.ne.s32.totalorder %s894_s28, %s1285_s29  ;;  %p1291_p12 = scmp.lt.s32.totalorder %s1285_s29, %s1285_s29 }
  0x52   :  { %981 = vmatpush3.bf16.msra.mxu0 %v1169_v26 }
  0x53   :  { %1003 = vmatpush3.bf16.msra.mxu1 %v1170_v27  ;;  %982 = vmatprep.subr.bf16.mxu0 %v1171_v28  ;;  %p1292_p13 = por %p1291_p12, %p1290_p11 }
  0x54   :  { %1004 = vmatprep.subr.bf16.mxu1 %v1172_v29  ;;  %v753_v29 = vlaneseq }
  0x55   :  { %p1293_p0 = pnand %p1292_p13, %p1286_p10 }
  0x56   :  { %983 = vmatpush3.bf16.msra.mxu0 %v1173_v30  ;;  %v754_v30 = vand.u32 127, %v753_v29 }
  0x57   :  { %1005 = vmatpush3.bf16.msra.mxu1 %v1174_v31  ;;  %1012 = vmatprep.subr.bf16.mxu0 %v1175_v40 }
  0x58   :  { %1034 = vmatprep.subr.bf16.mxu1 %v1176_v41  ;;  %vm785_vm0 = vcmp.ge.s32.totalorder %v754_v30, 20  ;;  %vm786_vm1 = vcmp.lt.s32.totalorder %v754_v30, 30  ;;  %vm756_vm3 = vcmp.lt.s32.totalorder %v754_v30, 10  ;;  %vm770_vm4 = vcmp.ge.s32.totalorder %v754_v30, 10 }
  0x59   :  { %626 = vmatmul.mubr.bf16.vlgmr.msra.gmra.mrb[0].mxu0 %v66_v37  ;;  %vm787_vm2 = vmand %vm785_vm0, %vm786_vm1  ;;  %vm771_vm5 = vcmp.lt.s32.totalorder %v754_v30, 20 }
  0x5a   :  { %666 = vmatmul.mubr.bf16.vlgmr.msra.gmra.mrb[0].mxu1 %v68_v39  ;;  %1013 = vmatpush3.bf16.msra.mxu0 %v1177_v42  ;;  %vm772_vm6 = vmand %vm770_vm4, %vm771_vm5 }
  0x5b   :  { %1035 = vmatpush3.bf16.msra.mxu1 %v1178_v43  ;;  %1014 = vmatprep.subr.bf16.mxu0 %v1179_v44 }
  0x5c   :  { %1036 = vmatprep.subr.bf16.mxu1 %v1180_v45  ;;  %705 = vmatprep.mubr.bf16.mxu0 %v71_v10  ;;  %v810_v10 = vld [vmem:[#allocation7 + $0x50] sm:$0xff] }
  0x5d   :  { %745 = vmatprep.mubr.bf16.mxu1 %v73_v11  ;;  %v811_v11 = vld [vmem:[#allocation7 + $0x58] sm:$0xff] }
  0x5e   :  { %1015 = vmatpush3.bf16.msra.mxu0 %v1181_v46  ;;  %v800_v46 = vld [vmem:[#allocation7] sm:$0xff]  ;;  %v1124_v12 = vpack.c.bf16 %v811_v11, %v810_v10 }
  0x5f   :  { %1037 = vmatpush3.bf16.msra.mxu1 %v1182_v47  ;;  %1016 = vmatprep.subr.bf16.mxu0 %v1183_v48  ;;  %v801_v47 = vld [vmem:[#allocation7 + $0x8] sm:$0xff]  ;;  %v802_v48 = vld [vmem:[#allocation7 + $0x10] sm:$0xff] }
  0x60   :  { %1038 = vmatprep.subr.bf16.mxu1 %v1184_v49  ;;  %v1320_v49 = vmov 0.0|0.0  }
  0x62   :  { %1017 = vmatpush3.bf16.msra.mxu0 %v1185_v50  ;;  %v1109_v50 = vpack.c.bf16 %v801_v47, %v800_v46 }
  0x63   :  { %1039 = vmatpush3.bf16.msra.mxu1 %v1186_v51  ;;  %1018 = vmatprep.subr.bf16.mxu0 %v1187_v52  ;;  %v803_v51 = vld [vmem:[#allocation7 + $0x18] sm:$0xff] }
  0x64   :  { %1040 = vmatprep.subr.bf16.mxu1 %v1188_v53  ;;  %v1112_v52 = vpack.c.bf16 %v803_v51, %v802_v48 }
  0x66   :  { %1019 = vmatpush3.bf16.msra.mxu0 %v1189_v54 }
  0x67   :  { %1041 = vmatpush3.bf16.msra.mxu1 %v1190_v55  ;;  %1020 = vmatprep.subr.bf16.mxu0 %v1191_v56 }
  0x68   :  { %1042 = vmatprep.subr.bf16.mxu1 %v1192_v57 }
  0x6a   :  { %1021 = vmatpush3.bf16.msra.mxu0 %v1193_v58 }
  0x6b   :  { %1043 = vmatpush3.bf16.msra.mxu1 %v1194_v59  ;;  %1022 = vmatprep.subr.bf16.mxu0 %v1195_v60 }
  0x6c   :  { %1044 = vmatprep.subr.bf16.mxu1 %v1196_v61 }
  0x6e   :  { %1023 = vmatpush3.bf16.msra.mxu0 %v1197_v62 }
  0x6f   :  { %1045 = vmatpush3.bf16.msra.mxu1 %v1198_v63  ;;  %1024 = vmatprep.subr.bf16.mxu0 %v1199_v0 }
  0x70   :  { %1046 = vmatprep.subr.bf16.mxu1 %v1200_v1  ;;  %v804_v1 = vld [vmem:[#allocation7 + $0x20] sm:$0xff] }
  0x72   :  { %1025 = vmatpush3.bf16.msra.mxu0 %v1201_v2  ;;  %v805_v2 = vld [vmem:[#allocation7 + $0x28] sm:$0xff] }
  0x73   :  { %1047 = vmatpush3.bf16.msra.mxu1 %v1202_v3  ;;  %1026 = vmatprep.subr.bf16.mxu0 %v1203_v4  ;;  %v1115_v3 = vpack.c.bf16 %v805_v2, %v804_v1  ;;  %v806_v4 = vld [vmem:[#allocation7 + $0x30] sm:$0xff] }
  0x74   :  { %1048 = vmatprep.subr.bf16.mxu1 %v1204_v5  ;;  %v807_v5 = vld [vmem:[#allocation7 + $0x38] sm:$0xff] }
  0x76   :  { %1027 = vmatpush3.bf16.msra.mxu0 %v1205_v6  ;;  %v1118_v6 = vpack.c.bf16 %v807_v5, %v806_v4 }
  0x77   :  { %1049 = vmatpush3.bf16.msra.mxu1 %v1206_v7  ;;  %1108 = vmatprep.subr.bf16.mxu0 %v1320_v49  ;;  %v808_v7 = vld [vmem:[#allocation7 + $0x40] sm:$0xff] }
  0x78   :  { %v1121_v9 = vpack.c.bf16 %v809_v8, %v808_v7 }
  0x79   :  { %706 = vmatmul.mubr.bf16.vlgmr.msra.gmra.mrb[4].mxu0 %v70_v14  ;;  %v813_v14 = vld [vmem:[#allocation7 + $0x68] sm:$0xff] }
  0x7a   :  { %746 = vmatmul.mubr.bf16.vlgmr.msra.gmra.mrb[4].mxu1 %v72_v15  ;;  %1110 = vmatpush3.bf16.msra.mxu0 %v1109_v50  ;;  %v1127_v15 = vpack.c.bf16 %v813_v14, %v812_v13 }
  0x7b   :  { %1111 = vmatprep.subr.bf16.mxu0 %v1320_v49 }
  0x7e   :  { %1113 = vmatpush3.bf16.msra.mxu0 %v1112_v52 }
  0x7f   :  { %1114 = vmatprep.subr.bf16.mxu0 %v1320_v49 }
  0x82   :  { %1116 = vmatpush3.bf16.msra.mxu0 %v1115_v3 }
  0x83   :  { %1117 = vmatprep.subr.bf16.mxu0 %v1320_v49 }
  0x86   :  { %1119 = vmatpush3.bf16.msra.mxu0 %v1118_v6 }
  0x87   :  { %1120 = vmatprep.subr.bf16.mxu0 %v1320_v49 }
  0x8a   :  { %1122 = vmatpush3.bf16.msra.mxu0 %v1121_v9 }
  0x8b   :  { %1123 = vmatprep.subr.bf16.mxu0 %v1320_v49 }
  0x8e   :  { %1125 = vmatpush3.bf16.msra.mxu0 %v1124_v12 }
  0x8f   :  { %1126 = vmatprep.subr.bf16.mxu0 %v1320_v49 }
  0x92   :  { %1128 = vmatpush3.bf16.msra.mxu0 %v1127_v15 }
  0x93   :  { %1129 = vmatprep.subr.bf16.mxu0 %v1320_v49 }
 0x12c   :  { %v984_v16 = vpop.f32.mrb[0].mxu0 }
 0x12d   :  { %v1006_v17 = vpop.f32.mrb[0].mxu1  ;;  %v985_v19 = vpop.f32.mrb[1].mxu0 }
 0x12e   :  { %v1007_v20 = vpop.f32.mrb[1].mxu1  ;;  %v986_v21 = vadd.f32 %v985_v19, %v984_v16  ;;  %v987_v23 = vpop.f32.mrb[2].mxu0  ;;  %v814_v16 = vld [vmem:[#allocation7 + $0x70] sm:$0xff]  ;;  %v1322_v19 = vmov 0.0  }
 0x12f   :  { %v1008_v22 = vadd.f32 %v1007_v20, %v1006_v17  ;;  %v1009_v24 = vpop.f32.mrb[2].mxu1  ;;  %v988_v25 = vpop.f32.mrb[3].mxu0  ;;  %v815_v17 = vld [vmem:[#allocation7 + $0x78] sm:$0xff]  ;;  %1105 = vmatprep.mubr.msk.f32.mxu0 %vm1321_vm7, %v1322_v19 }
 0x130   :  { %v1010_v26 = vpop.f32.mrb[3].mxu1  ;;  %v628_v27 = vadd.f32 %v986_v21, %v903_v18  ;;  %v1130_v18 = vpack.c.bf16 %v815_v17, %v814_v16 }
 0x132   :  { %v668_v28 = vadd.f32 %v1008_v22, %v628_v27  ;;  %1131 = vmatpush3.bf16.msra.mxu0 %v1130_v18 }
 0x14c   :  { %v1028_v31 = vpop.f32.mrb[4].mxu0 }
 0x14d   :  { %v1050_v32 = vpop.f32.mrb[4].mxu1  ;;  %v1029_v33 = vpop.f32.mrb[5].mxu0 }
 0x14e   :  { %v1030_v34 = vadd.f32 %v1029_v33, %v1028_v31  ;;  %v1051_v35 = vpop.f32.mrb[5].mxu1  ;;  %v1031_v36 = vpop.f32.mrb[6].mxu0 }
 0x14f   :  { %v1052_v37 = vadd.f32 %v1051_v35, %v1050_v32  ;;  %v1053_v38 = vpop.f32.mrb[6].mxu1  ;;  %v1032_v39 = vpop.f32.mrb[7].mxu0 }
 0x150   :  { %v708_v40 = vadd.f32 %v1030_v34, %v668_v28  ;;  %v1054_v41 = vpop.f32.mrb[7].mxu1 }
 0x152   :  { %v748_v42 = vadd.f32 %v1052_v37, %v708_v40 }
 0x154   :  { %v788_v43 = vsel %vm787_vm2, %v748_v42, -1e+30  ;;  %v758_v44 = vsel %vm756_vm3, %v748_v42, -1e+30  ;;  %v773_v45 = vsel %vm772_vm6, %v748_v42, -1e+30 }
 0x155   :  { %789 = vmax.xlane.f32.xlu1 %v788_v43  ;;  %759 = vmax.xlane.f32.xlu0 %v758_v44 }
 0x159   :  { %774 = vmax.xlane.f32.xlu0 %v773_v45 }
 0x1e2   :  { %v790_v53 = vpop.xlane.xlu1 %789  ;;  %v760_v54 = vpop.xlane.xlu0 %759 }
 0x1e3   :  { %v761_v55 = vsub.f32 %v758_v44, %v760_v54  ;;  %v791_v56 = vsub.f32 %v788_v43, %v790_v53 }
 0x1e5   :  { %v762_v57 = vmul.f32 1.442695, %v761_v55  ;;  %v792_v60 = vmul.f32 1.442695, %v791_v56 }
 0x1e6   :  { %v775_v58 = vpop.xlane.xlu0 %774 }
 0x1e7   :  { %v776_v59 = vsub.f32 %v773_v45, %v775_v58  ;;  %1207 = vpow2.f32 %v762_v57 }
 0x1e9   :  { %v777_v61 = vmul.f32 1.442695, %v776_v59 }
 0x1eb   :  { %1209 = vpow2.f32 %v777_v61 }
 0x1ec   :  { %1211 = vpow2.f32 %v792_v60 }
 0x1f1   :  { %v1208_v62 = vpop.eup %1207 }
 0x1f2   :  { %764 = vadd.xlane.f32.xlu1 %v1208_v62 }
 0x1f5   :  { %v1210_v63 = vpop.eup %1209 }
 0x1f6   :  { %v1212_v0 = vpop.eup %1211  ;;  %779 = vadd.xlane.f32.xlu0 %v1210_v63 }
 0x1f7   :  { %794 = vadd.xlane.f32.xlu1 %v1212_v0 }
 0x27f   :  { %v765_v20 = vpop.xlane.xlu1 %764 }
 0x280   :  { %1213 = vrcp.f32 %v765_v20 }
 0x283   :  { %v780_v21 = vpop.xlane.xlu0 %779 }
 0x284   :  { %v795_v22 = vpop.xlane.xlu1 %794  ;;  %1215 = vrcp.f32 %v780_v21 }
 0x285   :  { %1217 = vrcp.f32 %v795_v22 }
 0x28a   :  { %v1214_v23 = vpop.eup %1213 }
 0x28b   :  { %v767_v24 = vmul.f32 0.33333334, %v1214_v23 }
 0x28d   :  { %v768_v29 = vmul.f32 %v1208_v62, %v767_v24 }
 0x28e   :  { %v1216_v25 = vpop.eup %1215 }
 0x28f   :  { %v1218_v26 = vpop.eup %1217  ;;  %v782_v27 = vmul.f32 0.33333334, %v1216_v25 }
 0x290   :  { %v797_v28 = vmul.f32 0.33333334, %v1218_v26 }
 0x291   :  { %v783_v30 = vmul.f32 %v1210_v63, %v782_v27 }
 0x292   :  { %v798_v31 = vmul.f32 %v1212_v0, %v797_v28 }
 0x293   :  { %v784_v32 = vadd.f32 %v783_v30, %v768_v29 }
 0x295   :  { %v799_v33 = vadd.f32 %v798_v31, %v784_v32 }
 0x297   :  { %1106 = vmatmul.mubr.f32.vlgmr.msra.gmra.mrb[8].mxu0 %v799_v33 }
 0x36a   :  { %v882_v34 = vpop.f32.mrb[8].mxu0 }
 0x36b   :  { %886 = vst [vmem:[#allocation8] sm:$0xff] %v882_v34  ;;  %v1107_v35 = vpop.f32.mrb[9].mxu0 }
 0x36c   :  { %1296 = shalt.err (!%p1293_p0)
}
 0x36d   :  { %s1297_s6 = scalar_lea.hbm %s1404_s4, 128 }
 0x36e   :  { %p1298_p1 = scmp.ne.s32.totalorder %s1404_s4, %s1297_s6  ;;  %p1301_p2 = scmp.lt.u32.totalorder %s1297_s6, %s1404_s4 }
 0x370   :  { %p1303_p3 = pnand %p1301_p2, %p1298_p1 }
 0x372   :  { %1306 = shalt.err (!%p1303_p3)
}
 0x373   :  { %896 = dma.vmem_to_hbm [thread:$0]  %s894_s28, 128, %s1404_s4, [#allocation4]  }
 0x374   :  { %1311 = dma.done.wait [#allocation4], 128  }
 0x375   :  { %1312 = vsyncadd [#allocation4], 4294967168 }
 0x376   :  { %900 = vsyncpa [#allocation3], 1 }
 0x377   :  { %901 = vsyncpa [#allocation6], 1 }
 0x378   :  { %902 = vsyncpa [#allocation4], 1 }

// kernel: tpu_custom_call.1
= control target key start
LH: loop header
LB: loop body
LE: loop exit
PB: predicated region body
PF: predicated region fallthrough
CT: control target
= control target key end

     0   :  { %9 = vsyncpa [#allocation3], 0  ;;  %s1400_s0 = inlined_call_operand.hbm [shape: f32[8,1024], index: 0, kind: input, shape index: {}]   ;;  %s1401_s1 = inlined_call_operand.hbm [shape: bf16[1024,128], index: 1, kind: input, shape index: {}]   ;;  %s1402_s2 = inlined_call_operand.vmem [shape: f32[1,128], index: 2, kind: input, shape index: {}]   ;;  %s1403_s3 = inlined_call_operand.hbm [shape: f32[128,128], index: 3, kind: input, shape index: {}]   ;;  %s1404_s4 = inlined_call_operand.hbm [shape: f32[8,128], index: 4, kind: output, shape index: {}]  }
   0x1   :  { %10 = vsyncpa [#allocation6], 0 }
   0x2   :  { %11 = vsyncpa [#allocation4], 0  ;;  %s1313_s15 = smov [#allocation5]   ;;  %s1219_s19 = scalar_lea.hbm %s1401_s1, 8192 }
   0x3   :  { %s27_s16 = sshll.u32 %s1313_s15, 4  ;;  %p1220_p0 = scmp.ne.s32.totalorder %s1401_s1, %s1219_s19  ;;  %s28_s16 = int_to_ptr.vmem [resolvable:$true] %s27_s16 }
   0x4   :  { %p1223_p1 = scmp.lt.u32.totalorder %s1219_s19, %s1401_s1 }
   0x6   :  { %p1225_p2 = pnand %p1223_p1, %p1220_p0 }
   0x8   :  { %1228 = shalt.err (!%p1225_p2)
}
   0x9   :  { %s1229_s24 = scalar_lea.vmem %s28_s16, 8192  ;;  %p1234_p4 = scmp.lt.s32.totalorder %s28_s16, %s28_s16 }
   0xa   :  { %p1230_p3 = scmp.ne.s32.totalorder %s28_s16, %s1229_s24  ;;  %p1235_p5 = scmp.lt.s32.totalorder %s1229_s24, %s1229_s24 }
   0xc   :  { %p1236_p6 = por %p1235_p5, %p1234_p4 }
   0xe   :  { %p1237_p7 = pnand %p1236_p6, %p1230_p3 }
  0x10   :  { %1240 = shalt.err (!%p1237_p7)
}
  0x11   :  { %s1314_s25 = smov 64   ;;  %s1315_s26 = smov 4  }
  0x12   :  { %33 = dma.hbm_to_vmem [thread:$0]  %s1401_s1, 8192, %s28_s16, [#allocation6], %s1314_s25, %s1314_s25, %s1315_s26  }
  0x13   :  { %s1316_s29 = smov [#allocation2]   ;;  %s1317_s5 = smov [#allocation7]  }
  0x14   :  { %s18_s30 = sshll.u32 %s1316_s29, 4  ;;  %s41_s6 = sshll.u32 %s1317_s5, 4  ;;  %s19_s30 = int_to_ptr.vmem [resolvable:$true] %s18_s30  ;;  %s42_s6 = int_to_ptr.vmem [resolvable:$true] %s41_s6 }
  0x15   :  { %s1241_s9 = scalar_lea.hbm %s1400_s0, 1024 }
  0x16   :  { %p1242_p8 = scmp.ne.s32.totalorder %s1400_s0, %s1241_s9  ;;  %p1245_p9 = scmp.lt.u32.totalorder %s1241_s9, %s1400_s0 }
  0x18   :  { %p1247_p10 = pnand %p1245_p9, %p1242_p8 }
  0x1a   :  { %1250 = shalt.err (!%p1247_p10)
}
  0x1b   :  { %s1251_s1 = scalar_lea.vmem %s19_s30, 1024  ;;  %p1256_p12 = scmp.lt.s32.totalorder %s19_s30, %s19_s30 }
  0x1c   :  { %p1252_p11 = scmp.ne.s32.totalorder %s19_s30, %s1251_s1  ;;  %p1257_p13 = scmp.lt.s32.totalorder %s1251_s1, %s1251_s1 }
  0x1e   :  { %p1258_p0 = por %p1257_p13, %p1256_p12 }
  0x20   :  { %p1259_p1 = pnand %p1258_p0, %p1252_p11 }
  0x22   :  { %1262 = shalt.err (!%p1259_p1)
}
  0x23   :  { %21 = dma.hbm_to_vmem [thread:$0]  %s1400_s0, 1024, %s19_s30, [#allocation3]  }
  0x24   :  { %s1263_s18 = scalar_lea.hbm %s1403_s3, 2048 }
  0x25   :  { %p1264_p2 = scmp.ne.s32.totalorder %s1403_s3, %s1263_s18  ;;  %p1267_p3 = scmp.lt.u32.totalorder %s1263_s18, %s1403_s3 }
  0x27   :  { %p1269_p4 = pnand %p1267_p3, %p1264_p2 }
  0x29   :  { %1272 = shalt.err (!%p1269_p4)
}
  0x2a   :  { %s1273_s23 = scalar_lea.vmem %s42_s6, 2048  ;;  %p1278_p6 = scmp.lt.s32.totalorder %s42_s6, %s42_s6 }
  0x2b   :  { %p1274_p5 = scmp.ne.s32.totalorder %s42_s6, %s1273_s23  ;;  %p1279_p7 = scmp.lt.s32.totalorder %s1273_s23, %s1273_s23 }
  0x2d   :  { %p1280_p8 = por %p1279_p7, %p1278_p6 }
  0x2f   :  { %p1281_p9 = pnand %p1280_p8, %p1274_p5 }
  0x31   :  { %1284 = shalt.err (!%p1281_p9)
}
  0x32   :  { %s1318_s0 = smov 128   ;;  %s1319_s24 = smov 8  }
  0x33   :  { %47 = dma.hbm_to_vmem [thread:$0]  %s1403_s3, 2048, %s42_s6, [#allocation6], %s1318_s0, %s1318_s0, %s1319_s24  }
  0x34   :  { %1307 = dma.done.wait [#allocation3], 1024  }
  0x35   :  { %1308 = vsyncadd [#allocation3], 4294966272 }
  0x36   :  { %1309 = dma.done.wait [#allocation6], 10240  }
  0x37   :  { %1310 = vsyncadd [#allocation6], 4294957056  ;;  %v1143_v0 = vld [vmem:[#allocation5 + $0x40] sm:$0xff]   ;;  %v1147_v4 = vld [vmem:[#allocation5 + $0x48] sm:$0xff]   ;;  %vm1321_vm7 = vmmov 0  }
  0x38   :  { %v1144_v1 = vld [vmem:[#allocation5 + $0xc0] sm:$0xff]   ;;  %968 = vmatprep.subr.bf16.mxu0 %v1143_v0  ;;  %v1148_v5 = vld [vmem:[#allocation5 + $0xc8] sm:$0xff]   ;;  %v1151_v8 = vld [vmem:[#allocation5 + $0x50] sm:$0xff]  }
  0x39   :  { %v1145_v2 = vld [vmem:[#allocation5] sm:$0xff]   ;;  %990 = vmatprep.subr.bf16.mxu1 %v1144_v1  ;;  %v1149_v6 = vld [vmem:[#allocation5 + $0x8] sm:$0xff]   ;;  %v1152_v9 = vld [vmem:[#allocation5 + $0xd0] sm:$0xff]  }
  0x3a   :  { %v1146_v3 = vld [vmem:[#allocation5 + $0x80] sm:$0xff]   ;;  %969 = vmatpush3.bf16.msra.mxu0 %v1145_v2  ;;  %v1150_v7 = vld [vmem:[#allocation5 + $0x88] sm:$0xff]   ;;  %v1153_v10 = vld [vmem:[#allocation5 + $0x10] sm:$0xff]  }
  0x3b   :  { %991 = vmatpush3.bf16.msra.mxu1 %v1146_v3  ;;  %970 = vmatprep.subr.bf16.mxu0 %v1147_v4  ;;  %v1154_v11 = vld [vmem:[#allocation5 + $0x90] sm:$0xff]   ;;  %v1155_v12 = vld [vmem:[#allocation5 + $0x58] sm:$0xff]   ;;  %v1159_v16 = vld [vmem:[#allocation5 + $0x60] sm:$0xff]  }
  0x3c   :  { %992 = vmatprep.subr.bf16.mxu1 %v1148_v5  ;;  %v1156_v13 = vld [vmem:[#allocation5 + $0xd8] sm:$0xff]   ;;  %v1160_v17 = vld [vmem:[#allocation5 + $0xe0] sm:$0xff]   ;;  %v1163_v20 = vld [vmem:[#allocation5 + $0x68] sm:$0xff]  }
  0x3d   :  { %v1157_v14 = vld [vmem:[#allocation5 + $0x18] sm:$0xff]   ;;  %v1161_v18 = vld [vmem:[#allocation5 + $0x20] sm:$0xff]   ;;  %v1164_v21 = vld [vmem:[#allocation5 + $0xe8] sm:$0xff]  }
  0x3e   :  { %971 = vmatpush3.bf16.msra.mxu0 %v1149_v6  ;;  %v1158_v15 = vld [vmem:[#allocation5 + $0x98] sm:$0xff]   ;;  %v1162_v19 = vld [vmem:[#allocation5 + $0xa0] sm:$0xff]   ;;  %v1165_v22 = vld [vmem:[#allocation5 + $0x28] sm:$0xff]  }
  0x3f   :  { %993 = vmatpush3.bf16.msra.mxu1 %v1150_v7  ;;  %972 = vmatprep.subr.bf16.mxu0 %v1151_v8  ;;  %v1166_v23 = vld [vmem:[#allocation5 + $0xa8] sm:$0xff]   ;;  %v1167_v24 = vld [vmem:[#allocation5 + $0x70] sm:$0xff]   ;;  %v1171_v28 = vld [vmem:[#allocation5 + $0x78] sm:$0xff]  }
  0x40   :  { %994 = vmatprep.subr.bf16.mxu1 %v1152_v9  ;;  %v1168_v25 = vld [vmem:[#allocation5 + $0xf0] sm:$0xff]   ;;  %v1172_v29 = vld [vmem:[#allocation5 + $0xf8] sm:$0xff]   ;;  %v59_v32 = vld [vmem:[#allocation2 + $0x8] sm:$0xff] }
  0x41   :  { %v1169_v26 = vld [vmem:[#allocation5 + $0x30] sm:$0xff]   ;;  %v1173_v30 = vld [vmem:[#allocation5 + $0x38] sm:$0xff]   ;;  %v58_v34 = vld [vmem:[#allocation2] sm:$0xff]  ;;  %v67_v35 = vpack.c.bf16 %v59_v32, %v59_v32 }
  0x42   :  { %973 = vmatpush3.bf16.msra.mxu0 %v1153_v10  ;;  %v1170_v27 = vld [vmem:[#allocation5 + $0xb0] sm:$0xff]   ;;  %v1174_v31 = vld [vmem:[#allocation5 + $0xb8] sm:$0xff]   ;;  %v66_v37 = vpack.c.bf16 %v58_v34, %v58_v34  ;;  %v1175_v40 = vld [vmem:[#allocation5 + $0x140] sm:$0xff]  }
  0x43   :  { %995 = vmatpush3.bf16.msra.mxu1 %v1154_v11  ;;  %974 = vmatprep.subr.bf16.mxu0 %v1155_v12  ;;  %v61_v33 = vld [vmem:[#allocation2 + $0x18] sm:$0xff]  ;;  %v60_v38 = vld [vmem:[#allocation2 + $0x10] sm:$0xff]  ;;  %v1176_v41 = vld [vmem:[#allocation5 + $0x1c0] sm:$0xff]  }
  0x44   :  { %996 = vmatprep.subr.bf16.mxu1 %v1156_v13  ;;  %v69_v36 = vpack.c.bf16 %v61_v33, %v61_v33  ;;  %v68_v39 = vpack.c.bf16 %v60_v38, %v60_v38  ;;  %625 = vmatprep.mubr.bf16.mxu0 %v67_v35  ;;  %v1177_v42 = vld [vmem:[#allocation5 + $0x100] sm:$0xff]   ;;  %v1179_v44 = vld [vmem:[#allocation5 + $0x148] sm:$0xff]   ;;  %v1183_v48 = vld [vmem:[#allocation5 + $0x150] sm:$0xff]  }
  0x45   :  { %v1178_v43 = vld [vmem:[#allocation5 + $0x180] sm:$0xff]   ;;  %v1180_v45 = vld [vmem:[#allocation5 + $0x1c8] sm:$0xff]   ;;  %v1184_v49 = vld [vmem:[#allocation5 + $0x1d0] sm:$0xff]  }
  0x46   :  { %975 = vmatpush3.bf16.msra.mxu0 %v1157_v14  ;;  %665 = vmatprep.mubr.bf16.mxu1 %v69_v36  ;;  %v1181_v46 = vld [vmem:[#allocation5 + $0x108] sm:$0xff]   ;;  %v1185_v50 = vld [vmem:[#allocation5 + $0x110] sm:$0xff]   ;;  %v1187_v52 = vld [vmem:[#allocation5 + $0x158] sm:$0xff]  }
  0x47   :  { %997 = vmatpush3.bf16.msra.mxu1 %v1158_v15  ;;  %976 = vmatprep.subr.bf16.mxu0 %v1159_v16  ;;  %v1182_v47 = vld [vmem:[#allocation5 + $0x188] sm:$0xff]   ;;  %v1186_v51 = vld [vmem:[#allocation5 + $0x190] sm:$0xff]   ;;  %v1188_v53 = vld [vmem:[#allocation5 + $0x1d8] sm:$0xff]  }
  0x48   :  { %998 = vmatprep.subr.bf16.mxu1 %v1160_v17  ;;  %v1189_v54 = vld [vmem:[#allocation5 + $0x118] sm:$0xff]   ;;  %v1191_v56 = vld [vmem:[#allocation5 + $0x160] sm:$0xff]   ;;  %v1195_v60 = vld [vmem:[#allocation5 + $0x168] sm:$0xff]  }
  0x49   :  { %v1190_v55 = vld [vmem:[#allocation5 + $0x198] sm:$0xff]   ;;  %v1192_v57 = vld [vmem:[#allocation5 + $0x1e0] sm:$0xff]   ;;  %v1196_v61 = vld [vmem:[#allocation5 + $0x1e8] sm:$0xff]  }
  0x4a   :  { %977 = vmatpush3.bf16.msra.mxu0 %v1161_v18  ;;  %v1193_v58 = vld [vmem:[#allocation5 + $0x120] sm:$0xff]   ;;  %v1197_v62 = vld [vmem:[#allocation5 + $0x128] sm:$0xff]   ;;  %v1199_v0 = vld [vmem:[#allocation5 + $0x170] sm:$0xff]  }
  0x4b   :  { %999 = vmatpush3.bf16.msra.mxu1 %v1162_v19  ;;  %978 = vmatprep.subr.bf16.mxu0 %v1163_v20  ;;  %v1194_v59 = vld [vmem:[#allocation5 + $0x1a0] sm:$0xff]   ;;  %v1198_v63 = vld [vmem:[#allocation5 + $0x1a8] sm:$0xff]   ;;  %v1200_v1 = vld [vmem:[#allocation5 + $0x1f0] sm:$0xff]  }
  0x4c   :  { %1000 = vmatprep.subr.bf16.mxu1 %v1164_v21  ;;  %v1201_v2 = vld [vmem:[#allocation5 + $0x130] sm:$0xff]   ;;  %v1203_v4 = vld [vmem:[#allocation5 + $0x178] sm:$0xff]   ;;  %v63_v8 = vld [vmem:[#allocation2 + $0x28] sm:$0xff] }
  0x4d   :  { %v1202_v3 = vld [vmem:[#allocation5 + $0x1b0] sm:$0xff]   ;;  %v1204_v5 = vld [vmem:[#allocation5 + $0x1f8] sm:$0xff]   ;;  %v71_v10 = vpack.c.bf16 %v63_v8, %v63_v8  ;;  %v62_v12 = vld [vmem:[#allocation2 + $0x20] sm:$0xff] }
  0x4e   :  { %979 = vmatpush3.bf16.msra.mxu0 %v1165_v22  ;;  %v1205_v6 = vld [vmem:[#allocation5 + $0x138] sm:$0xff]   ;;  %v64_v13 = vld [vmem:[#allocation2 + $0x30] sm:$0xff]  ;;  %v70_v14 = vpack.c.bf16 %v62_v12, %v62_v12  ;;  %v903_v18 = vld [vmem:[%s1402_s2] ss:$0 sm:$0xff]  ;;  %s1323_s2 = smov [#allocation8]  }
  0x4f   :  { %1001 = vmatpush3.bf16.msra.mxu1 %v1166_v23  ;;  %980 = vmatprep.subr.bf16.mxu0 %v1167_v24  ;;  %v1206_v7 = vld [vmem:[#allocation5 + $0x1b8] sm:$0xff]   ;;  %v72_v15 = vpack.c.bf16 %v64_v13, %v64_v13  ;;  %v809_v8 = vld [vmem:[#allocation7 + $0x48] sm:$0xff]  ;;  %v812_v13 = vld [vmem:[#allocation7 + $0x60] sm:$0xff]  ;;  %s893_s28 = sshll.u32 %s1323_s2, 4  ;;  %s894_s28 = int_to_ptr.vmem [resolvable:$true] %s893_s28 }
  0x50   :  { %1002 = vmatprep.subr.bf16.mxu1 %v1168_v25  ;;  %v65_v9 = vld [vmem:[#allocation2 + $0x38] sm:$0xff]  ;;  %s1285_s29 = scalar_lea.vmem %s894_s28, 128  ;;  %p1290_p11 = scmp.lt.s32.totalorder %s894_s28, %s894_s28 }
  0x51   :  { %v73_v11 = vpack.c.bf16 %v65_v9, %v65_v9  ;;  %p1286_p10 = scmp.ne.s32.totalorder %s894_s28, %s1285_s29  ;;  %p1291_p12 = scmp.lt.s32.totalorder %s1285_s29, %s1285_s29 }
  0x52   :  { %981 = vmatpush3.bf16.msra.mxu0 %v1169_v26 }
  0x53   :  { %1003 = vmatpush3.bf16.msra.mxu1 %v1170_v27  ;;  %982 = vmatprep.subr.bf16.mxu0 %v1171_v28  ;;  %p1292_p13 = por %p1291_p12, %p1290_p11 }
  0x54   :  { %1004 = vmatprep.subr.bf16.mxu1 %v1172_v29  ;;  %v753_v29 = vlaneseq }
  0x55   :  { %p1293_p0 = pnand %p1292_p13, %p1286_p10 }
  0x56   :  { %983 = vmatpush3.bf16.msra.mxu0 %v1173_v30  ;;  %v754_v30 = vand.u32 127, %v753_v29 }
  0x57   :  { %1005 = vmatpush3.bf16.msra.mxu1 %v1174_v31  ;;  %1012 = vmatprep.subr.bf16.mxu0 %v1175_v40 }
  0x58   :  { %1034 = vmatprep.subr.bf16.mxu1 %v1176_v41  ;;  %vm785_vm0 = vcmp.ge.s32.totalorder %v754_v30, 20  ;;  %vm786_vm1 = vcmp.lt.s32.totalorder %v754_v30, 30  ;;  %vm756_vm3 = vcmp.lt.s32.totalorder %v754_v30, 10  ;;  %vm770_vm4 = vcmp.ge.s32.totalorder %v754_v30, 10 }
  0x59   :  { %626 = vmatmul.mubr.bf16.vlgmr.msra.gmra.mrb[0].mxu0 %v66_v37  ;;  %vm787_vm2 = vmand %vm785_vm0, %vm786_vm1  ;;  %vm771_vm5 = vcmp.lt.s32.totalorder %v754_v30, 20 }
  0x5a   :  { %666 = vmatmul.mubr.bf16.vlgmr.msra.gmra.mrb[0].mxu1 %v68_v39  ;;  %1013 = vmatpush3.bf16.msra.mxu0 %v1177_v42  ;;  %vm772_vm6 = vmand %vm770_vm4, %vm771_vm5 }
  0x5b   :  { %1035 = vmatpush3.bf16.msra.mxu1 %v1178_v43  ;;  %1014 = vmatprep.subr.bf16.mxu0 %v1179_v44 }
  0x5c   :  { %1036 = vmatprep.subr.bf16.mxu1 %v1180_v45  ;;  %705 = vmatprep.mubr.bf16.mxu0 %v71_v10  ;;  %v810_v10 = vld [vmem:[#allocation7 + $0x50] sm:$0xff] }
  0x5d   :  { %745 = vmatprep.mubr.bf16.mxu1 %v73_v11  ;;  %v811_v11 = vld [vmem:[#allocation7 + $0x58] sm:$0xff] }
  0x5e   :  { %1015 = vmatpush3.bf16.msra.mxu0 %v1181_v46  ;;  %v800_v46 = vld [vmem:[#allocation7] sm:$0xff]  ;;  %v1124_v12 = vpack.c.bf16 %v811_v11, %v810_v10 }
  0x5f   :  { %1037 = vmatpush3.bf16.msra.mxu1 %v1182_v47  ;;  %1016 = vmatprep.subr.bf16.mxu0 %v1183_v48  ;;  %v801_v47 = vld [vmem:[#allocation7 + $0x8] sm:$0xff]  ;;  %v802_v48 = vld [vmem:[#allocation7 + $0x10] sm:$0xff] }
  0x60   :  { %1038 = vmatprep.subr.bf16.mxu1 %v1184_v49  ;;  %v1320_v49 = vmov 0.0|0.0  }
  0x62   :  { %1017 = vmatpush3.bf16.msra.mxu0 %v1185_v50  ;;  %v1109_v50 = vpack.c.bf16 %v801_v47, %v800_v46 }
  0x63   :  { %1039 = vmatpush3.bf16.msra.mxu1 %v1186_v51  ;;  %1018 = vmatprep.subr.bf16.mxu0 %v1187_v52  ;;  %v803_v51 = vld [vmem:[#allocation7 + $0x18] sm:$0xff] }
  0x64   :  { %1040 = vmatprep.subr.bf16.mxu1 %v1188_v53  ;;  %v1112_v52 = vpack.c.bf16 %v803_v51, %v802_v48 }
  0x66   :  { %1019 = vmatpush3.bf16.msra.mxu0 %v1189_v54 }
  0x67   :  { %1041 = vmatpush3.bf16.msra.mxu1 %v1190_v55  ;;  %1020 = vmatprep.subr.bf16.mxu0 %v1191_v56 }
  0x68   :  { %1042 = vmatprep.subr.bf16.mxu1 %v1192_v57 }
  0x6a   :  { %1021 = vmatpush3.bf16.msra.mxu0 %v1193_v58 }
  0x6b   :  { %1043 = vmatpush3.bf16.msra.mxu1 %v1194_v59  ;;  %1022 = vmatprep.subr.bf16.mxu0 %v1195_v60 }
  0x6c   :  { %1044 = vmatprep.subr.bf16.mxu1 %v1196_v61 }
  0x6e   :  { %1023 = vmatpush3.bf16.msra.mxu0 %v1197_v62 }
  0x6f   :  { %1045 = vmatpush3.bf16.msra.mxu1 %v1198_v63  ;;  %1024 = vmatprep.subr.bf16.mxu0 %v1199_v0 }
  0x70   :  { %1046 = vmatprep.subr.bf16.mxu1 %v1200_v1  ;;  %v804_v1 = vld [vmem:[#allocation7 + $0x20] sm:$0xff] }
  0x72   :  { %1025 = vmatpush3.bf16.msra.mxu0 %v1201_v2  ;;  %v805_v2 = vld [vmem:[#allocation7 + $0x28] sm:$0xff] }
  0x73   :  { %1047 = vmatpush3.bf16.msra.mxu1 %v1202_v3  ;;  %1026 = vmatprep.subr.bf16.mxu0 %v1203_v4  ;;  %v1115_v3 = vpack.c.bf16 %v805_v2, %v804_v1  ;;  %v806_v4 = vld [vmem:[#allocation7 + $0x30] sm:$0xff] }
  0x74   :  { %1048 = vmatprep.subr.bf16.mxu1 %v1204_v5  ;;  %v807_v5 = vld [vmem:[#allocation7 + $0x38] sm:$0xff] }
  0x76   :  { %1027 = vmatpush3.bf16.msra.mxu0 %v1205_v6  ;;  %v1118_v6 = vpack.c.bf16 %v807_v5, %v806_v4 }
  0x77   :  { %1049 = vmatpush3.bf16.msra.mxu1 %v1206_v7  ;;  %1108 = vmatprep.subr.bf16.mxu0 %v1320_v49  ;;  %v808_v7 = vld [vmem:[#allocation7 + $0x40] sm:$0xff] }
  0x78   :  { %v1121_v9 = vpack.c.bf16 %v809_v8, %v808_v7 }
  0x79   :  { %706 = vmatmul.mubr.bf16.vlgmr.msra.gmra.mrb[4].mxu0 %v70_v14  ;;  %v813_v14 = vld [vmem:[#allocation7 + $0x68] sm:$0xff] }
  0x7a   :  { %746 = vmatmul.mubr.bf16.vlgmr.msra.gmra.mrb[4].mxu1 %v72_v15  ;;  %1110 = vmatpush3.bf16.msra.mxu0 %v1109_v50  ;;  %v1127_v15 = vpack.c.bf16 %v813_v14, %v812_v13 }
  0x7b   :  { %1111 = vmatprep.subr.bf16.mxu0 %v1320_v49 }
  0x7e   :  { %1113 = vmatpush3.bf16.msra.mxu0 %v1112_v52 }
  0x7f   :  { %1114 = vmatprep.subr.bf16.mxu0 %v1320_v49 }
  0x82   :  { %1116 = vmatpush3.bf16.msra.mxu0 %v1115_v3 }
  0x83   :  { %1117 = vmatprep.subr.bf16.mxu0 %v1320_v49 }
  0x86   :  { %1119 = vmatpush3.bf16.msra.mxu0 %v1118_v6 }
  0x87   :  { %1120 = vmatprep.subr.bf16.mxu0 %v1320_v49 }
  0x8a   :  { %1122 = vmatpush3.bf16.msra.mxu0 %v1121_v9 }
  0x8b   :  { %1123 = vmatprep.subr.bf16.mxu0 %v1320_v49 }
  0x8e   :  { %1125 = vmatpush3.bf16.msra.mxu0 %v1124_v12 }
  0x8f   :  { %1126 = vmatprep.subr.bf16.mxu0 %v1320_v49 }
  0x92   :  { %1128 = vmatpush3.bf16.msra.mxu0 %v1127_v15 }
  0x93   :  { %1129 = vmatprep.subr.bf16.mxu0 %v1320_v49 }
 0x12c   :  { %v984_v16 = vpop.f32.mrb[0].mxu0 }
 0x12d   :  { %v1006_v17 = vpop.f32.mrb[0].mxu1  ;;  %v985_v19 = vpop.f32.mrb[1].mxu0 }
 0x12e   :  { %v1007_v20 = vpop.f32.mrb[1].mxu1  ;;  %v986_v21 = vadd.f32 %v985_v19, %v984_v16  ;;  %v987_v23 = vpop.f32.mrb[2].mxu0  ;;  %v814_v16 = vld [vmem:[#allocation7 + $0x70] sm:$0xff]  ;;  %v1322_v19 = vmov 0.0  }
 0x12f   :  { %v1008_v22 = vadd.f32 %v1007_v20, %v1006_v17  ;;  %v1009_v24 = vpop.f32.mrb[2].mxu1  ;;  %v988_v25 = vpop.f32.mrb[3].mxu0  ;;  %v815_v17 = vld [vmem:[#allocation7 + $0x78] sm:$0xff]  ;;  %1105 = vmatprep.mubr.msk.f32.mxu0 %vm1321_vm7, %v1322_v19 }
 0x130   :  { %v1010_v26 = vpop.f32.mrb[3].mxu1  ;;  %v628_v27 = vadd.f32 %v986_v21, %v903_v18  ;;  %v1130_v18 = vpack.c.bf16 %v815_v17, %v814_v16 }
 0x132   :  { %v668_v28 = vadd.f32 %v1008_v22, %v628_v27  ;;  %1131 = vmatpush3.bf16.msra.mxu0 %v1130_v18 }
 0x14c   :  { %v1028_v31 = vpop.f32.mrb[4].mxu0 }
 0x14d   :  { %v1050_v32 = vpop.f32.mrb[4].mxu1  ;;  %v1029_v33 = vpop.f32.mrb[5].mxu0 }
 0x14e   :  { %v1030_v34 = vadd.f32 %v1029_v33, %v1028_v31  ;;  %v1051_v35 = vpop.f32.mrb[5].mxu1  ;;  %v1031_v36 = vpop.f32.mrb[6].mxu0 }
 0x14f   :  { %v1052_v37 = vadd.f32 %v1051_v35, %v1050_v32  ;;  %v1053_v38 = vpop.f32.mrb[6].mxu1  ;;  %v1032_v39 = vpop.f32.mrb[7].mxu0 }
 0x150   :  { %v708_v40 = vadd.f32 %v1030_v34, %v668_v28  ;;  %v1054_v41 = vpop.f32.mrb[7].mxu1 }
 0x152   :  { %v748_v42 = vadd.f32 %v1052_v37, %v708_v40 }
 0x154   :  { %v788_v43 = vsel %vm787_vm2, %v748_v42, -1e+30  ;;  %v758_v44 = vsel %vm756_vm3, %v748_v42, -1e+30  ;;  %v773_v45 = vsel %vm772_vm6, %v748_v42, -1e+30 }
 0x155   :  { %789 = vmax.xlane.f32.xlu1 %v788_v43  ;;  %759 = vmax.xlane.f32.xlu0 %v758_v44 }
 0x159   :  { %774 = vmax.xlane.f32.xlu0 %v773_v45 }
 0x1e2   :  { %v790_v53 = vpop.xlane.xlu1 %789  ;;  %v760_v54 = vpop.xlane.xlu0 %759 }
 0x1e3   :  { %v761_v55 = vsub.f32 %v758_v44, %v760_v54  ;;  %v791_v56 = vsub.f32 %v788_v43, %v790_v53 }
 0x1e5   :  { %v762_v57 = vmul.f32 1.442695, %v761_v55  ;;  %v792_v60 = vmul.f32 1.442695, %v791_v56 }
 0x1e6   :  { %v775_v58 = vpop.xlane.xlu0 %774 }
 0x1e7   :  { %v776_v59 = vsub.f32 %v773_v45, %v775_v58  ;;  %1207 = vpow2.f32 %v762_v57 }
 0x1e9   :  { %v777_v61 = vmul.f32 1.442695, %v776_v59 }
 0x1eb   :  { %1209 = vpow2.f32 %v777_v61 }
 0x1ec   :  { %1211 = vpow2.f32 %v792_v60 }
 0x1f1   :  { %v1208_v62 = vpop.eup %1207 }
 0x1f2   :  { %764 = vadd.xlane.f32.xlu1 %v1208_v62 }
 0x1f5   :  { %v1210_v63 = vpop.eup %1209 }
 0x1f6   :  { %v1212_v0 = vpop.eup %1211  ;;  %779 = vadd.xlane.f32.xlu0 %v1210_v63 }
 0x1f7   :  { %794 = vadd.xlane.f32.xlu1 %v1212_v0 }
 0x27f   :  { %v765_v20 = vpop.xlane.xlu1 %764 }
 0x280   :  { %1213 = vrcp.f32 %v765_v20 }
 0x283   :  { %v780_v21 = vpop.xlane.xlu0 %779 }
 0x284   :  { %v795_v22 = vpop.xlane.xlu1 %794  ;;  %1215 = vrcp.f32 %v780_v21 }
 0x285   :  { %1217 = vrcp.f32 %v795_v22 }
 0x28a   :  { %v1214_v23 = vpop.eup %1213 }
 0x28b   :  { %v767_v24 = vmul.f32 0.33333334, %v1214_v23 }
 0x28d   :  { %v768_v29 = vmul.f32 %v1208_v62, %v767_v24 }
 0x28e   :  { %v1216_v25 = vpop.eup %1215 }
 0x28f   :  { %v1218_v26 = vpop.eup %1217  ;;  %v782_v27 = vmul.f32 0.33333334, %v1216_v25 }
 0x290   :  { %v797_v28 = vmul.f32 0.33333334, %v1218_v26 }
 0x291   :  { %v783_v30 = vmul.f32 %v1210_v63, %v782_v27 }
 0x292   :  { %v798_v31 = vmul.f32 %v1212_v0, %v797_v28 }
 0x293   :  { %v784_v32 = vadd.f32 %v783_v30, %v768_v29 }
 0x295   :  { %v799_v33 = vadd.f32 %v798_v31, %v784_v32 }
 0x297   :  { %1106 = vmatmul.mubr.f32.vlgmr.msra.gmra.mrb[8].mxu0 %v799_v33 }
 0x36a   :  { %v882_v34 = vpop.f32.mrb[8].mxu0 }
 0x36b   :  { %886 = vst [vmem:[#allocation8] sm:$0xff] %v882_v34  ;;  %v1107_v35 = vpop.f32.mrb[9].mxu0 }
 0x36c   :  { %1296 = shalt.err (!%p1293_p0)
}
 0x36d   :  { %s1297_s6 = scalar_lea.hbm %s1404_s4, 128 }
 0x36e   :  { %p1298_p1 = scmp.ne.s32.totalorder %s1404_s4, %s1297_s6  ;;  %p1301_p2 = scmp.lt.u32.totalorder %s1297_s6, %s1404_s4 }
 0x370   :  { %p1303_p3 = pnand %p1301_p2, %p1298_p1 }
 0x372   :  { %1306 = shalt.err (!%p1303_p3)
}
 0x373   :  { %896 = dma.vmem_to_hbm [thread:$0]  %s894_s28, 128, %s1404_s4, [#allocation4]  }
 0x374   :  { %1311 = dma.done.wait [#allocation4], 128  }
 0x375   :  { %1312 = vsyncadd [#allocation4], 4294967168 }
 0x376   :  { %900 = vsyncpa [#allocation3], 1 }
 0x377   :  { %901 = vsyncpa [#allocation6], 1 }
 0x378   :  { %902 = vsyncpa [#allocation4], 1 }

</bundles_post_ra>
